<compile_context>
chip_gen: v7x
topology: tpu7x:2x2x1
jax: 0.10.0
libtpu: 0.0.40
codegen_flags: <defaults>
</compile_context>

<pallas_src>
import math
from functools import partial

import jax
import jax.numpy as jnp
from jax.experimental import pallas as pl
from jax.experimental.pallas import tpu as pltpu

# ----------------------- model hyperparameters (small) -----------------------
BATCH = 2
SET_SIZE = 8
CH = 4
KS = 2
ST = 2
NR = 8
NC = 8
DIM_HIDDEN = 32
NUM_HEADS = 4
P_OUTPUTS = 2
DIM_OUTPUT = 2

RNR = (NR - KS) // ST + 1          # 4
RNC = (NC - KS) // ST + 1          # 4
D_IN = CH * RNR * RNC              # 64

FUSED_ORDER = [
    "w_enc1", "b_enc1", "w_enc2", "b_enc2",
    "w_qkv1", "b_qkv1", "wo1", "bo1",
    "seed0", "wq2", "bq2", "w_kv2", "b_kv2", "wo2", "bo2",
    "wd", "bd",
]


# ----------------------------- shared math ----------------------------------
def _layernorm(x, eps=1e-5):
    # nn.LayerNorm(dim, elementwise_affine=False): biased variance, eps=1e-5.
    mu = jnp.mean(x, axis=-1, keepdims=True)
    var = jnp.mean((x - mu) ** 2, axis=-1, keepdims=True)
    return (x - mu) * jax.lax.rsqrt(var + eps)


def _mh_attention(Qp, Kp, Vp, num_heads, dim_V):
    """Batched multi-head 'Q + softmax(QK^T/sqrt(dim_V)) V'.

    Qp: (B, nq, dim_V), Kp/Vp: (B, nk, dim_V). Heads are feature-dim blocks,
    exactly like torch's Q.split(dim_split, 2). The head loop is unrolled at
    trace time (4 iterations) — each iteration is a single batched einsum over
    the whole batch, so there is no per-example work.
    """
    ds = dim_V // num_heads
    scale = 1.0 / math.sqrt(dim_V)       # Set-Transformer scales by sqrt(dim_V), not sqrt(ds)
    outs = []
    for hh in range(num_heads):
        sl = slice(hh * ds, (hh + 1) * ds)
        Qh, Kh, Vh = Qp[..., sl], Kp[..., sl], Vp[..., sl]
        logits = jnp.einsum('bqd,bkd->bqk', Qh, Kh,
                            preferred_element_type=jnp.float32) * scale
        A = jax.nn.softmax(logits, axis=-1)
        outs.append(Qh + jnp.einsum('bqk,bkd->bqd', A, Vh,
                                    preferred_element_type=jnp.float32))
    return jnp.concatenate(outs, axis=-1)      # heads back along feature dim


def _mab(Q, K, Wq, bq, Wk, bk, Wv, bv, Wo, bo, num_heads, dim_V):
    """Reference-only: MAB(Q, K) with ln=True for a single example (unfused)."""
    Qp = jnp.dot(Q, Wq, preferred_element_type=jnp.float32) + bq
    Kp = jnp.dot(K, Wk, preferred_element_type=jnp.float32) + bk
    Vp = jnp.dot(K, Wv, preferred_element_type=jnp.float32) + bv
    ds = dim_V // num_heads
    scale = 1.0 / math.sqrt(dim_V)
    outs = []
    for h in range(num_heads):
        sl = slice(h * ds, (h + 1) * ds)
        Qh, Kh, Vh = Qp[:, sl], Kp[:, sl], Vp[:, sl]
        logits = jnp.dot(Qh, Kh.T, preferred_element_type=jnp.float32) * scale
        A = jax.nn.softmax(logits, axis=-1)
        outs.append(Qh + jnp.dot(A, Vh, preferred_element_type=jnp.float32))
    O = jnp.concatenate(outs, axis=-1)
    O = _layernorm(O)                        # ln0
    O = O + jax.nn.sigmoid(jnp.dot(O, Wo, preferred_element_type=jnp.float32) + bo)
    O = _layernorm(O)                        # ln1
    return O


# ----------------------------- Pallas kernel ---------------------------------
def quan2_kernel(x_ref,
                 w_enc1, b_enc1, w_enc2, b_enc2,
                 w_qkv1, b_qkv1, wo1, bo1,
                 seed0, wq2, bq2, w_kv2, b_kv2, wo2, bo2,
                 wd, bd,
                 out_ref,
                 *, num_heads, dim_hidden, batch, set_size):
    B, S, Dh = batch, set_size, dim_hidden

    # ---- encoder MLP on the flattened batch: (B*S, D_IN) ----
    x = x_ref[...]                                                       # (B*S, D_IN)
    h = jax.nn.sigmoid(jnp.dot(x, w_enc1[...],
                               preferred_element_type=jnp.float32) + b_enc1[...])
    h = jax.nn.sigmoid(jnp.dot(h, w_enc2[...],
                               preferred_element_type=jnp.float32) + b_enc2[...])   # (B*S, Dh)

    # ---- SAB (Q == K): fused QKV projection, batched multi-head attention ----
    qkv = jnp.dot(h, w_qkv1[...], preferred_element_type=jnp.float32) + b_qkv1[...]  # (B*S, 3Dh)
    qkv = qkv.reshape(B, S, 3 * Dh)
    Qp, Kp, Vp = qkv[:, :, 0:Dh], qkv[:, :, Dh:2 * Dh], qkv[:, :, 2 * Dh:3 * Dh]
    O = _mh_attention(Qp, Kp, Vp, num_heads, Dh)                         # (B, S, Dh)
    Of = _layernorm(O).reshape(B * S, Dh)                                # ln0 (row-wise)
    Of = Of + jax.nn.sigmoid(jnp.dot(Of, wo1[...],
                                     preferred_element_type=jnp.float32) + bo1[...])
    Of = _layernorm(Of)                                                  # ln1
    Hf = jax.nn.sigmoid(Of)                                              # outer sigmoid

    # ---- PMA (seed 0 only): fused K|V projection, batched attention, nq = 1 ----
    qs = jnp.dot(seed0[...], wq2[...],
                 preferred_element_type=jnp.float32) + bq2[...]          # (1, Dh)
    kv = jnp.dot(Hf, w_kv2[...], preferred_element_type=jnp.float32) + b_kv2[...]    # (B*S, 2Dh)
    kv = kv.reshape(B, S, 2 * Dh)
    Kp2, Vp2 = kv[:, :, 0:Dh], kv[:, :, Dh:2 * Dh]
    Qp2 = jnp.broadcast_to(qs.reshape(1, 1, Dh), (B, 1, Dh))
    P = _mh_attention(Qp2, Kp2, Vp2, num_heads, Dh)[:, 0, :]             # (B, Dh)
    P = _layernorm(P)                                                    # ln0
    P = P + jax.nn.sigmoid(jnp.dot(P, wo2[...],
                                   preferred_element_type=jnp.float32) + bo2[...])
    P = _layernorm(P)                                                    # ln1

    # ---- decoder Linear + Sigmoid (seed 0 already selected) ----
    y = jax.nn.sigmoid(jnp.dot(P, wd[...],
                               preferred_element_type=jnp.float32) + bd[...])        # (B, D_OUT)
    out_ref[...] = y


# ----------------------------- host wrapper ----------------------------------
def _fuse_params(params):
    """Host-side constant folding: stack QKV / KV weights, slice seed 0."""
    return {
        "w_enc1": params["w1"], "b_enc1": params["b1"],
        "w_enc2": params["w2"], "b_enc2": params["b2"],
        "w_qkv1": jnp.concatenate([params["wq1"], params["wk1"], params["wv1"]], axis=1),
        "b_qkv1": jnp.concatenate([params["bq1"], params["bk1"], params["bv1"]], axis=1),
        "wo1": params["wo1"], "bo1": params["bo1"],
        "seed0": params["s_seed"][0:1],      # only seed 0 is ever read downstream
        "wq2": params["wq2"], "bq2": params["bq2"],
        "w_kv2": jnp.concatenate([params["wk2"], params["wv2"]], axis=1),
        "b_kv2": jnp.concatenate([params["bk2"], params["bv2"]], axis=1),
        "wo2": params["wo2"], "bo2": params["bo2"],
        "wd": params["wd"], "bd": params["bd"],
    }


@jax.jit
def quan2_forward(x_raw, params):
    B = x_raw.shape[0]
    # torch-style row-major .view to (B, set_size, Ch*rNr*rNc), then flatten the
    # batch so the kernel's encoder matmuls cover all B*SET_SIZE rows at once.
    x = x_raw.reshape(B * SET_SIZE, D_IN).astype(jnp.float32)
    fused = _fuse_params(params)
    args = [x] + [fused[k] for k in FUSED_ORDER]

    # Whole-array VMEM blocks, no grid: one kernel invocation for the full batch
    # (total footprint ~100 KiB, trivially under VMEM on v5e/v6e/v7x).
    in_specs = [pl.BlockSpec(memory_space=pltpu.MemorySpace.VMEM) for _ in args]
    out = pl.pallas_call(
        partial(quan2_kernel, num_heads=NUM_HEADS, dim_hidden=DIM_HIDDEN,
                batch=B, set_size=SET_SIZE),
        out_shape=jax.ShapeDtypeStruct((B, DIM_OUTPUT), jnp.float32),
        in_specs=in_specs,
        out_specs=pl.BlockSpec(memory_space=pltpu.MemorySpace.VMEM),
    )(*args)
    return out                                                            # (B, DIM_OUTPUT)


# ----------------------------- parameter init --------------------------------
def init_params(key):
    def lin(k, fan_in, fan_out):
        k1, k2 = jax.random.split(k)
        w = jax.random.normal(k1, (fan_in, fan_out), jnp.float32) / math.sqrt(fan_in)
        b = jax.random.normal(k2, (1, fan_out), jnp.float32) * 0.01
        return w, b

    keys = jax.random.split(key, 12)
    p = {}
    p["w1"], p["b1"] = lin(keys[0], D_IN, 3 * DIM_HIDDEN)
    p["w2"], p["b2"] = lin(keys[1], 3 * DIM_HIDDEN, DIM_HIDDEN)
    p["wq1"], p["bq1"] = lin(keys[2], DIM_HIDDEN, DIM_HIDDEN)
    p["wk1"], p["bk1"] = lin(keys[3], DIM_HIDDEN, DIM_HIDDEN)
    p["wv1"], p["bv1"] = lin(keys[4], DIM_HIDDEN, DIM_HIDDEN)
    p["wo1"], p["bo1"] = lin(keys[5], DIM_HIDDEN, DIM_HIDDEN)
    p["s_seed"] = jax.random.normal(keys[6], (P_OUTPUTS, DIM_HIDDEN), jnp.float32) * \
        math.sqrt(2.0 / (P_OUTPUTS + DIM_HIDDEN))
    p["wq2"], p["bq2"] = lin(keys[7], DIM_HIDDEN, DIM_HIDDEN)
    p["wk2"], p["bk2"] = lin(keys[8], DIM_HIDDEN, DIM_HIDDEN)
    p["wv2"], p["bv2"] = lin(keys[9], DIM_HIDDEN, DIM_HIDDEN)
    p["wo2"], p["bo2"] = lin(keys[10], DIM_HIDDEN, DIM_HIDDEN)
    p["wd"], p["bd"] = lin(keys[11], DIM_HIDDEN, DIM_OUTPUT)
    return p


# --------------------------- pure-JAX reference -------------------------------
def ref_forward(x_raw, params):
    """Unfused reference (computes BOTH PMA seeds, then takes row 0)."""
    x = x_raw.reshape(x_raw.shape[0], SET_SIZE, D_IN).astype(jnp.float32)

    def per_example(xe):
        h = jax.nn.sigmoid(xe @ params["w1"] + params["b1"])
        h = jax.nn.sigmoid(h @ params["w2"] + params["b2"])
        h = _mab(h, h,
                 params["wq1"], params["bq1"], params["wk1"], params["bk1"],
                 params["wv1"], params["bv1"], params["wo1"], params["bo1"],
                 NUM_HEADS, DIM_HIDDEN)
        h = jax.nn.sigmoid(h)
        p = _mab(params["s_seed"], h,
                 params["wq2"], params["bq2"], params["wk2"], params["bk2"],
                 params["wv2"], params["bv2"], params["wo2"], params["bo2"],
                 NUM_HEADS, DIM_HIDDEN)
        y = jax.nn.sigmoid(p @ params["wd"] + params["bd"])
        return y[0]

    return jax.vmap(per_example)(x)


# ---------------------------------- main --------------------------------------
if __name__ == "__main__":
    key = jax.random.PRNGKey(0)
    kx, kp = jax.random.split(key)
    # raw input (B, set_size, Ch, rNr, rNc) -> view(-1, set_size, Ch*rNr*rNc)
    x_raw = jax.random.normal(kx, (BATCH, SET_SIZE, CH, RNR, RNC), jnp.float32)
    params = init_params(kp)

    out = jax.block_until_ready(quan2_forward(x_raw, params))
    ref = jax.block_until_ready(ref_forward(x_raw, params))

    assert out.shape == (BATCH, DIM_OUTPUT), out.shape
    if not jnp.allclose(out, ref, atol=2e-4, rtol=2e-4):
        raise AssertionError("Pallas kernel output does not match JAX reference")
    print("KERNEL_OK")
</pallas_src>

<mosaic_0001>
module attributes {stable_mosaic.version = 11 : i64} {
  func.func @quan2_kernel(%arg0: memref<16x64xf32, #tpu.memory_space<vmem>>, %arg1: memref<64x96xf32, #tpu.memory_space<vmem>>, %arg2: memref<1x96xf32, #tpu.memory_space<vmem>>, %arg3: memref<96x32xf32, #tpu.memory_space<vmem>>, %arg4: memref<1x32xf32, #tpu.memory_space<vmem>>, %arg5: memref<32x96xf32, #tpu.memory_space<vmem>>, %arg6: memref<1x96xf32, #tpu.memory_space<vmem>>, %arg7: memref<32x32xf32, #tpu.memory_space<vmem>>, %arg8: memref<1x32xf32, #tpu.memory_space<vmem>>, %arg9: memref<1x32xf32, #tpu.memory_space<vmem>>, %arg10: memref<32x32xf32, #tpu.memory_space<vmem>>, %arg11: memref<1x32xf32, #tpu.memory_space<vmem>>, %arg12: memref<32x64xf32, #tpu.memory_space<vmem>>, %arg13: memref<1x64xf32, #tpu.memory_space<vmem>>, %arg14: memref<32x32xf32, #tpu.memory_space<vmem>>, %arg15: memref<1x32xf32, #tpu.memory_space<vmem>>, %arg16: memref<32x2xf32, #tpu.memory_space<vmem>>, %arg17: memref<1x2xf32, #tpu.memory_space<vmem>>, %arg18: memref<2x2xf32, #tpu.memory_space<vmem>>) attributes {dimension_semantics = [], scalar_prefetch = 0 : i64, scratch_operands = 0 : i64, tpu.core_type = #tpu.core_type<tc>} {
    %c0 = arith.constant 0 : index
    %c0_0 = arith.constant 0 : index
    %0 = vector.load %arg0[%c0, %c0_0] : memref<16x64xf32, #tpu.memory_space<vmem>>, vector<16x64xf32>
    %c0_1 = arith.constant 0 : index
    %c0_2 = arith.constant 0 : index
    %1 = vector.load %arg1[%c0_1, %c0_2] : memref<64x96xf32, #tpu.memory_space<vmem>>, vector<64x96xf32>
    %cst = arith.constant dense<0.000000e+00> : vector<16x96xf32>
    %2 = tpu.matmul %0, %1, %cst {dimension_numbers = #tpu.dot_dimension_numbers<[1], [0], [0], [1], [0, 0, 1, 1], [], []>} : vector<16x64xf32>, vector<64x96xf32>, vector<16x96xf32> -> vector<16x96xf32>
    %c0_3 = arith.constant 0 : index
    %c0_4 = arith.constant 0 : index
    %3 = vector.load %arg2[%c0_3, %c0_4] : memref<1x96xf32, #tpu.memory_space<vmem>>, vector<1x96xf32>
    %4 = vector.broadcast %3 : vector<1x96xf32> to vector<16x96xf32>
    %5 = arith.addf %2, %4 : vector<16x96xf32>
    %6 = arith.negf %5 : vector<16x96xf32>
    %7 = math.exp %6 : vector<16x96xf32>
    %cst_5 = arith.constant 1.000000e+00 : f32
    %8 = vector.broadcast %cst_5 : f32 to vector<16x96xf32>
    %9 = arith.addf %8, %7 : vector<16x96xf32>
    %10 = arith.divf %8, %9 : vector<16x96xf32>
    %c0_6 = arith.constant 0 : index
    %c0_7 = arith.constant 0 : index
    %11 = vector.load %arg3[%c0_6, %c0_7] : memref<96x32xf32, #tpu.memory_space<vmem>>, vector<96x32xf32>
    %cst_8 = arith.constant dense<0.000000e+00> : vector<16x32xf32>
    %12 = tpu.matmul %10, %11, %cst_8 {dimension_numbers = #tpu.dot_dimension_numbers<[1], [0], [0], [1], [0, 0, 1, 1], [], []>} : vector<16x96xf32>, vector<96x32xf32>, vector<16x32xf32> -> vector<16x32xf32>
    %c0_9 = arith.constant 0 : index
    %c0_10 = arith.constant 0 : index
    %13 = vector.load %arg4[%c0_9, %c0_10] : memref<1x32xf32, #tpu.memory_space<vmem>>, vector<1x32xf32>
    %14 = vector.broadcast %13 : vector<1x32xf32> to vector<16x32xf32>
    %15 = arith.addf %12, %14 : vector<16x32xf32>
    %16 = arith.negf %15 : vector<16x32xf32>
    %17 = math.exp %16 : vector<16x32xf32>
    %cst_11 = arith.constant 1.000000e+00 : f32
    %18 = vector.broadcast %cst_11 : f32 to vector<16x32xf32>
    %19 = arith.addf %18, %17 : vector<16x32xf32>
    %20 = arith.divf %18, %19 : vector<16x32xf32>
    %c0_12 = arith.constant 0 : index
    %c0_13 = arith.constant 0 : index
    %21 = vector.load %arg5[%c0_12, %c0_13] : memref<32x96xf32, #tpu.memory_space<vmem>>, vector<32x96xf32>
    %cst_14 = arith.constant dense<0.000000e+00> : vector<16x96xf32>
    %22 = tpu.matmul %20, %21, %cst_14 {dimension_numbers = #tpu.dot_dimension_numbers<[1], [0], [0], [1], [0, 0, 1, 1], [], []>} : vector<16x32xf32>, vector<32x96xf32>, vector<16x96xf32> -> vector<16x96xf32>
    %c0_15 = arith.constant 0 : index
    %c0_16 = arith.constant 0 : index
    %23 = vector.load %arg6[%c0_15, %c0_16] : memref<1x96xf32, #tpu.memory_space<vmem>>, vector<1x96xf32>
    %24 = vector.broadcast %23 : vector<1x96xf32> to vector<16x96xf32>
    %25 = arith.addf %22, %24 : vector<16x96xf32>
    %26 = vector.shape_cast %25 : vector<16x96xf32> to vector<2x8x96xf32>
    %27 = vector.extract_strided_slice %26 {offsets = [0, 0, 0], sizes = [2, 8, 32], strides = [1, 1, 1]} : vector<2x8x96xf32> to vector<2x8x32xf32>
    %28 = vector.extract_strided_slice %26 {offsets = [0, 0, 32], sizes = [2, 8, 32], strides = [1, 1, 1]} : vector<2x8x96xf32> to vector<2x8x32xf32>
    %29 = vector.extract_strided_slice %26 {offsets = [0, 0, 64], sizes = [2, 8, 32], strides = [1, 1, 1]} : vector<2x8x96xf32> to vector<2x8x32xf32>
    %30 = vector.extract_strided_slice %27 {offsets = [0, 0, 0], sizes = [2, 8, 8], strides = [1, 1, 1]} : vector<2x8x32xf32> to vector<2x8x8xf32>
    %31 = vector.extract_strided_slice %28 {offsets = [0, 0, 0], sizes = [2, 8, 8], strides = [1, 1, 1]} : vector<2x8x32xf32> to vector<2x8x8xf32>
    %32 = vector.extract_strided_slice %29 {offsets = [0, 0, 0], sizes = [2, 8, 8], strides = [1, 1, 1]} : vector<2x8x32xf32> to vector<2x8x8xf32>
    "tpu.trace_start"() <{level = 10 : i32, message = "bqd,bkd->bqk"}> : () -> ()
    %cst_17 = arith.constant dense<0.000000e+00> : vector<2x8x8xf32>
    %33 = tpu.matmul %30, %31, %cst_17 {dimension_numbers = #tpu.dot_dimension_numbers<[2], [2], [1], [1], [0, 0, 0, 1, 1, 1], [0], [0]>} : vector<2x8x8xf32>, vector<2x8x8xf32>, vector<2x8x8xf32> -> vector<2x8x8xf32>
    "tpu.trace_stop"() : () -> ()
    %cst_18 = arith.constant 0.176776692 : f32
    %34 = vector.broadcast %cst_18 : f32 to vector<2x8x8xf32>
    %35 = arith.mulf %33, %34 : vector<2x8x8xf32>
    %cst_19 = arith.constant dense<0xFF800000> : vector<2x8xf32>
    %36 = vector.multi_reduction <maximumf>, %35, %cst_19 [2] : vector<2x8x8xf32> to vector<2x8xf32>
    %cst_20 = arith.constant 0xFF800000 : f32
    %37 = vector.broadcast %cst_20 : f32 to vector<2x8xf32>
    %38 = arith.maximumf %37, %36 : vector<2x8xf32>
    %39 = vector.shape_cast %38 : vector<2x8xf32> to vector<2x8x1xf32>
    %40 = vector.broadcast %39 : vector<2x8x1xf32> to vector<2x8x8xf32>
    %41 = arith.subf %35, %40 : vector<2x8x8xf32>
    %42 = math.exp %41 : vector<2x8x8xf32>
    %cst_21 = arith.constant dense<0.000000e+00> : vector<2x8xf32>
    %43 = vector.multi_reduction <add>, %42, %cst_21 [2] : vector<2x8x8xf32> to vector<2x8xf32>
    %44 = vector.shape_cast %43 : vector<2x8xf32> to vector<2x8x1xf32>
    %45 = vector.broadcast %44 : vector<2x8x1xf32> to vector<2x8x8xf32>
    %46 = arith.divf %42, %45 : vector<2x8x8xf32>
    "tpu.trace_start"() <{level = 10 : i32, message = "bqk,bkd->bqd"}> : () -> ()
    %cst_22 = arith.constant dense<0.000000e+00> : vector<2x8x8xf32>
    %47 = tpu.matmul %46, %32, %cst_22 {dimension_numbers = #tpu.dot_dimension_numbers<[2], [1], [1], [2], [0, 0, 0, 1, 1, 2], [0], [0]>} : vector<2x8x8xf32>, vector<2x8x8xf32>, vector<2x8x8xf32> -> vector<2x8x8xf32>
    "tpu.trace_stop"() : () -> ()
    %48 = arith.addf %30, %47 : vector<2x8x8xf32>
    %49 = vector.extract_strided_slice %27 {offsets = [0, 0, 8], sizes = [2, 8, 8], strides = [1, 1, 1]} : vector<2x8x32xf32> to vector<2x8x8xf32>
    %50 = vector.extract_strided_slice %28 {offsets = [0, 0, 8], sizes = [2, 8, 8], strides = [1, 1, 1]} : vector<2x8x32xf32> to vector<2x8x8xf32>
    %51 = vector.extract_strided_slice %29 {offsets = [0, 0, 8], sizes = [2, 8, 8], strides = [1, 1, 1]} : vector<2x8x32xf32> to vector<2x8x8xf32>
    "tpu.trace_start"() <{level = 10 : i32, message = "bqd,bkd->bqk"}> : () -> ()
    %cst_23 = arith.constant dense<0.000000e+00> : vector<2x8x8xf32>
    %52 = tpu.matmul %49, %50, %cst_23 {dimension_numbers = #tpu.dot_dimension_numbers<[2], [2], [1], [1], [0, 0, 0, 1, 1, 1], [0], [0]>} : vector<2x8x8xf32>, vector<2x8x8xf32>, vector<2x8x8xf32> -> vector<2x8x8xf32>
    "tpu.trace_stop"() : () -> ()
    %cst_24 = arith.constant 0.176776692 : f32
    %53 = vector.broadcast %cst_24 : f32 to vector<2x8x8xf32>
    %54 = arith.mulf %52, %53 : vector<2x8x8xf32>
    %cst_25 = arith.constant dense<0xFF800000> : vector<2x8xf32>
    %55 = vector.multi_reduction <maximumf>, %54, %cst_25 [2] : vector<2x8x8xf32> to vector<2x8xf32>
    %cst_26 = arith.constant 0xFF800000 : f32
    %56 = vector.broadcast %cst_26 : f32 to vector<2x8xf32>
    %57 = arith.maximumf %56, %55 : vector<2x8xf32>
    %58 = vector.shape_cast %57 : vector<2x8xf32> to vector<2x8x1xf32>
    %59 = vector.broadcast %58 : vector<2x8x1xf32> to vector<2x8x8xf32>
    %60 = arith.subf %54, %59 : vector<2x8x8xf32>
    %61 = math.exp %60 : vector<2x8x8xf32>
    %cst_27 = arith.constant dense<0.000000e+00> : vector<2x8xf32>
    %62 = vector.multi_reduction <add>, %61, %cst_27 [2] : vector<2x8x8xf32> to vector<2x8xf32>
    %63 = vector.shape_cast %62 : vector<2x8xf32> to vector<2x8x1xf32>
    %64 = vector.broadcast %63 : vector<2x8x1xf32> to vector<2x8x8xf32>
    %65 = arith.divf %61, %64 : vector<2x8x8xf32>
    "tpu.trace_start"() <{level = 10 : i32, message = "bqk,bkd->bqd"}> : () -> ()
    %cst_28 = arith.constant dense<0.000000e+00> : vector<2x8x8xf32>
    %66 = tpu.matmul %65, %51, %cst_28 {dimension_numbers = #tpu.dot_dimension_numbers<[2], [1], [1], [2], [0, 0, 0, 1, 1, 2], [0], [0]>} : vector<2x8x8xf32>, vector<2x8x8xf32>, vector<2x8x8xf32> -> vector<2x8x8xf32>
    "tpu.trace_stop"() : () -> ()
    %67 = arith.addf %49, %66 : vector<2x8x8xf32>
    %68 = vector.extract_strided_slice %27 {offsets = [0, 0, 16], sizes = [2, 8, 8], strides = [1, 1, 1]} : vector<2x8x32xf32> to vector<2x8x8xf32>
    %69 = vector.extract_strided_slice %28 {offsets = [0, 0, 16], sizes = [2, 8, 8], strides = [1, 1, 1]} : vector<2x8x32xf32> to vector<2x8x8xf32>
    %70 = vector.extract_strided_slice %29 {offsets = [0, 0, 16], sizes = [2, 8, 8], strides = [1, 1, 1]} : vector<2x8x32xf32> to vector<2x8x8xf32>
    "tpu.trace_start"() <{level = 10 : i32, message = "bqd,bkd->bqk"}> : () -> ()
    %cst_29 = arith.constant dense<0.000000e+00> : vector<2x8x8xf32>
    %71 = tpu.matmul %68, %69, %cst_29 {dimension_numbers = #tpu.dot_dimension_numbers<[2], [2], [1], [1], [0, 0, 0, 1, 1, 1], [0], [0]>} : vector<2x8x8xf32>, vector<2x8x8xf32>, vector<2x8x8xf32> -> vector<2x8x8xf32>
    "tpu.trace_stop"() : () -> ()
    %cst_30 = arith.constant 0.176776692 : f32
    %72 = vector.broadcast %cst_30 : f32 to vector<2x8x8xf32>
    %73 = arith.mulf %71, %72 : vector<2x8x8xf32>
    %cst_31 = arith.constant dense<0xFF800000> : vector<2x8xf32>
    %74 = vector.multi_reduction <maximumf>, %73, %cst_31 [2] : vector<2x8x8xf32> to vector<2x8xf32>
    %cst_32 = arith.constant 0xFF800000 : f32
    %75 = vector.broadcast %cst_32 : f32 to vector<2x8xf32>
    %76 = arith.maximumf %75, %74 : vector<2x8xf32>
    %77 = vector.shape_cast %76 : vector<2x8xf32> to vector<2x8x1xf32>
    %78 = vector.broadcast %77 : vector<2x8x1xf32> to vector<2x8x8xf32>
    %79 = arith.subf %73, %78 : vector<2x8x8xf32>
    %80 = math.exp %79 : vector<2x8x8xf32>
    %cst_33 = arith.constant dense<0.000000e+00> : vector<2x8xf32>
    %81 = vector.multi_reduction <add>, %80, %cst_33 [2] : vector<2x8x8xf32> to vector<2x8xf32>
    %82 = vector.shape_cast %81 : vector<2x8xf32> to vector<2x8x1xf32>
    %83 = vector.broadcast %82 : vector<2x8x1xf32> to vector<2x8x8xf32>
    %84 = arith.divf %80, %83 : vector<2x8x8xf32>
    "tpu.trace_start"() <{level = 10 : i32, message = "bqk,bkd->bqd"}> : () -> ()
    %cst_34 = arith.constant dense<0.000000e+00> : vector<2x8x8xf32>
    %85 = tpu.matmul %84, %70, %cst_34 {dimension_numbers = #tpu.dot_dimension_numbers<[2], [1], [1], [2], [0, 0, 0, 1, 1, 2], [0], [0]>} : vector<2x8x8xf32>, vector<2x8x8xf32>, vector<2x8x8xf32> -> vector<2x8x8xf32>
    "tpu.trace_stop"() : () -> ()
    %86 = arith.addf %68, %85 : vector<2x8x8xf32>
    %87 = vector.extract_strided_slice %27 {offsets = [0, 0, 24], sizes = [2, 8, 8], strides = [1, 1, 1]} : vector<2x8x32xf32> to vector<2x8x8xf32>
    %88 = vector.extract_strided_slice %28 {offsets = [0, 0, 24], sizes = [2, 8, 8], strides = [1, 1, 1]} : vector<2x8x32xf32> to vector<2x8x8xf32>
    %89 = vector.extract_strided_slice %29 {offsets = [0, 0, 24], sizes = [2, 8, 8], strides = [1, 1, 1]} : vector<2x8x32xf32> to vector<2x8x8xf32>
    "tpu.trace_start"() <{level = 10 : i32, message = "bqd,bkd->bqk"}> : () -> ()
    %cst_35 = arith.constant dense<0.000000e+00> : vector<2x8x8xf32>
    %90 = tpu.matmul %87, %88, %cst_35 {dimension_numbers = #tpu.dot_dimension_numbers<[2], [2], [1], [1], [0, 0, 0, 1, 1, 1], [0], [0]>} : vector<2x8x8xf32>, vector<2x8x8xf32>, vector<2x8x8xf32> -> vector<2x8x8xf32>
    "tpu.trace_stop"() : () -> ()
    %cst_36 = arith.constant 0.176776692 : f32
    %91 = vector.broadcast %cst_36 : f32 to vector<2x8x8xf32>
    %92 = arith.mulf %90, %91 : vector<2x8x8xf32>
    %cst_37 = arith.constant dense<0xFF800000> : vector<2x8xf32>
    %93 = vector.multi_reduction <maximumf>, %92, %cst_37 [2] : vector<2x8x8xf32> to vector<2x8xf32>
    %cst_38 = arith.constant 0xFF800000 : f32
    %94 = vector.broadcast %cst_38 : f32 to vector<2x8xf32>
    %95 = arith.maximumf %94, %93 : vector<2x8xf32>
    %96 = vector.shape_cast %95 : vector<2x8xf32> to vector<2x8x1xf32>
    %97 = vector.broadcast %96 : vector<2x8x1xf32> to vector<2x8x8xf32>
    %98 = arith.subf %92, %97 : vector<2x8x8xf32>
    %99 = math.exp %98 : vector<2x8x8xf32>
    %cst_39 = arith.constant dense<0.000000e+00> : vector<2x8xf32>
    %100 = vector.multi_reduction <add>, %99, %cst_39 [2] : vector<2x8x8xf32> to vector<2x8xf32>
    %101 = vector.shape_cast %100 : vector<2x8xf32> to vector<2x8x1xf32>
    %102 = vector.broadcast %101 : vector<2x8x1xf32> to vector<2x8x8xf32>
    %103 = arith.divf %99, %102 : vector<2x8x8xf32>
    "tpu.trace_start"() <{level = 10 : i32, message = "bqk,bkd->bqd"}> : () -> ()
    %cst_40 = arith.constant dense<0.000000e+00> : vector<2x8x8xf32>
    %104 = tpu.matmul %103, %89, %cst_40 {dimension_numbers = #tpu.dot_dimension_numbers<[2], [1], [1], [2], [0, 0, 0, 1, 1, 2], [0], [0]>} : vector<2x8x8xf32>, vector<2x8x8xf32>, vector<2x8x8xf32> -> vector<2x8x8xf32>
    "tpu.trace_stop"() : () -> ()
    %105 = arith.addf %87, %104 : vector<2x8x8xf32>
    %106 = tpu.concatenate %48, %67, %86, %105 in 2 : vector<2x8x8xf32>, vector<2x8x8xf32>, vector<2x8x8xf32>, vector<2x8x8xf32> -> vector<2x8x32xf32>
    %cst_41 = arith.constant dense<0.000000e+00> : vector<2x8xf32>
    %107 = vector.multi_reduction <add>, %106, %cst_41 [2] : vector<2x8x32xf32> to vector<2x8xf32>
    %108 = vector.shape_cast %107 : vector<2x8xf32> to vector<2x8x1xf32>
    %cst_42 = arith.constant 3.200000e+01 : f32
    %109 = vector.broadcast %cst_42 : f32 to vector<2x8x1xf32>
    %110 = arith.divf %108, %109 : vector<2x8x1xf32>
    %111 = vector.broadcast %110 : vector<2x8x1xf32> to vector<2x8x32xf32>
    %112 = arith.subf %106, %111 : vector<2x8x32xf32>
    %113 = arith.mulf %112, %112 : vector<2x8x32xf32>
    %cst_43 = arith.constant dense<0.000000e+00> : vector<2x8xf32>
    %114 = vector.multi_reduction <add>, %113, %cst_43 [2] : vector<2x8x32xf32> to vector<2x8xf32>
    %115 = vector.shape_cast %114 : vector<2x8xf32> to vector<2x8x1xf32>
    %cst_44 = arith.constant 3.200000e+01 : f32
    %116 = vector.broadcast %cst_44 : f32 to vector<2x8x1xf32>
    %117 = arith.divf %115, %116 : vector<2x8x1xf32>
    %118 = vector.broadcast %110 : vector<2x8x1xf32> to vector<2x8x32xf32>
    %119 = arith.subf %106, %118 : vector<2x8x32xf32>
    %cst_45 = arith.constant 9.99999974E-6 : f32
    %120 = vector.broadcast %cst_45 : f32 to vector<2x8x1xf32>
    %121 = arith.addf %117, %120 : vector<2x8x1xf32>
    %122 = math.rsqrt %121 : vector<2x8x1xf32>
    %123 = vector.broadcast %122 : vector<2x8x1xf32> to vector<2x8x32xf32>
    %124 = arith.mulf %119, %123 : vector<2x8x32xf32>
    %125 = vector.shape_cast %124 : vector<2x8x32xf32> to vector<16x32xf32>
    %c0_46 = arith.constant 0 : index
    %c0_47 = arith.constant 0 : index
    %126 = vector.load %arg7[%c0_46, %c0_47] : memref<32x32xf32, #tpu.memory_space<vmem>>, vector<32x32xf32>
    %cst_48 = arith.constant dense<0.000000e+00> : vector<16x32xf32>
    %127 = tpu.matmul %125, %126, %cst_48 {dimension_numbers = #tpu.dot_dimension_numbers<[1], [0], [0], [1], [0, 0, 1, 1], [], []>} : vector<16x32xf32>, vector<32x32xf32>, vector<16x32xf32> -> vector<16x32xf32>
    %c0_49 = arith.constant 0 : index
    %c0_50 = arith.constant 0 : index
    %128 = vector.load %arg8[%c0_49, %c0_50] : memref<1x32xf32, #tpu.memory_space<vmem>>, vector<1x32xf32>
    %129 = vector.broadcast %128 : vector<1x32xf32> to vector<16x32xf32>
    %130 = arith.addf %127, %129 : vector<16x32xf32>
    %131 = arith.negf %130 : vector<16x32xf32>
    %132 = math.exp %131 : vector<16x32xf32>
    %cst_51 = arith.constant 1.000000e+00 : f32
    %133 = vector.broadcast %cst_51 : f32 to vector<16x32xf32>
    %134 = arith.addf %133, %132 : vector<16x32xf32>
    %135 = arith.divf %133, %134 : vector<16x32xf32>
    %136 = arith.addf %125, %135 : vector<16x32xf32>
    %cst_52 = arith.constant dense<0.000000e+00> : vector<16xf32>
    %137 = vector.multi_reduction <add>, %136, %cst_52 [1] : vector<16x32xf32> to vector<16xf32>
    %138 = vector.shape_cast %137 : vector<16xf32> to vector<16x1xf32>
    %cst_53 = arith.constant 3.200000e+01 : f32
    %139 = vector.broadcast %cst_53 : f32 to vector<16x1xf32>
    %140 = arith.divf %138, %139 : vector<16x1xf32>
    %141 = vector.broadcast %140 : vector<16x1xf32> to vector<16x32xf32>
    %142 = arith.subf %136, %141 : vector<16x32xf32>
    %143 = arith.mulf %142, %142 : vector<16x32xf32>
    %cst_54 = arith.constant dense<0.000000e+00> : vector<16xf32>
    %144 = vector.multi_reduction <add>, %143, %cst_54 [1] : vector<16x32xf32> to vector<16xf32>
    %145 = vector.shape_cast %144 : vector<16xf32> to vector<16x1xf32>
    %cst_55 = arith.constant 3.200000e+01 : f32
    %146 = vector.broadcast %cst_55 : f32 to vector<16x1xf32>
    %147 = arith.divf %145, %146 : vector<16x1xf32>
    %148 = vector.broadcast %140 : vector<16x1xf32> to vector<16x32xf32>
    %149 = arith.subf %136, %148 : vector<16x32xf32>
    %cst_56 = arith.constant 9.99999974E-6 : f32
    %150 = vector.broadcast %cst_56 : f32 to vector<16x1xf32>
    %151 = arith.addf %147, %150 : vector<16x1xf32>
    %152 = math.rsqrt %151 : vector<16x1xf32>
    %153 = vector.broadcast %152 : vector<16x1xf32> to vector<16x32xf32>
    %154 = arith.mulf %149, %153 : vector<16x32xf32>
    %155 = arith.negf %154 : vector<16x32xf32>
    %156 = math.exp %155 : vector<16x32xf32>
    %cst_57 = arith.constant 1.000000e+00 : f32
    %157 = vector.broadcast %cst_57 : f32 to vector<16x32xf32>
    %158 = arith.addf %157, %156 : vector<16x32xf32>
    %159 = arith.divf %157, %158 : vector<16x32xf32>
    %c0_58 = arith.constant 0 : index
    %c0_59 = arith.constant 0 : index
    %160 = vector.load %arg9[%c0_58, %c0_59] : memref<1x32xf32, #tpu.memory_space<vmem>>, vector<1x32xf32>
    %c0_60 = arith.constant 0 : index
    %c0_61 = arith.constant 0 : index
    %161 = vector.load %arg10[%c0_60, %c0_61] : memref<32x32xf32, #tpu.memory_space<vmem>>, vector<32x32xf32>
    %cst_62 = arith.constant dense<0.000000e+00> : vector<1x32xf32>
    %162 = tpu.matmul %160, %161, %cst_62 {dimension_numbers = #tpu.dot_dimension_numbers<[1], [0], [0], [1], [0, 0, 1, 1], [], []>} : vector<1x32xf32>, vector<32x32xf32>, vector<1x32xf32> -> vector<1x32xf32>
    %c0_63 = arith.constant 0 : index
    %c0_64 = arith.constant 0 : index
    %163 = vector.load %arg11[%c0_63, %c0_64] : memref<1x32xf32, #tpu.memory_space<vmem>>, vector<1x32xf32>
    %164 = arith.addf %162, %163 : vector<1x32xf32>
    %c0_65 = arith.constant 0 : index
    %c0_66 = arith.constant 0 : index
    %165 = vector.load %arg12[%c0_65, %c0_66] : memref<32x64xf32, #tpu.memory_space<vmem>>, vector<32x64xf32>
    %cst_67 = arith.constant dense<0.000000e+00> : vector<16x64xf32>
    %166 = tpu.matmul %159, %165, %cst_67 {dimension_numbers = #tpu.dot_dimension_numbers<[1], [0], [0], [1], [0, 0, 1, 1], [], []>} : vector<16x32xf32>, vector<32x64xf32>, vector<16x64xf32> -> vector<16x64xf32>
    %c0_68 = arith.constant 0 : index
    %c0_69 = arith.constant 0 : index
    %167 = vector.load %arg13[%c0_68, %c0_69] : memref<1x64xf32, #tpu.memory_space<vmem>>, vector<1x64xf32>
    %168 = vector.broadcast %167 : vector<1x64xf32> to vector<16x64xf32>
    %169 = arith.addf %166, %168 : vector<16x64xf32>
    %170 = vector.shape_cast %169 : vector<16x64xf32> to vector<2x8x64xf32>
    %171 = vector.extract_strided_slice %170 {offsets = [0, 0, 0], sizes = [2, 8, 32], strides = [1, 1, 1]} : vector<2x8x64xf32> to vector<2x8x32xf32>
    %172 = vector.extract_strided_slice %170 {offsets = [0, 0, 32], sizes = [2, 8, 32], strides = [1, 1, 1]} : vector<2x8x64xf32> to vector<2x8x32xf32>
    %173 = vector.shape_cast %164 : vector<1x32xf32> to vector<1x1x32xf32>
    %174 = vector.shape_cast %173 : vector<1x1x32xf32> to vector<1x1x32xf32>
    %175 = vector.broadcast %174 : vector<1x1x32xf32> to vector<2x1x32xf32>
    %176 = vector.extract_strided_slice %175 {offsets = [0, 0, 0], sizes = [2, 1, 8], strides = [1, 1, 1]} : vector<2x1x32xf32> to vector<2x1x8xf32>
    %177 = vector.extract_strided_slice %171 {offsets = [0, 0, 0], sizes = [2, 8, 8], strides = [1, 1, 1]} : vector<2x8x32xf32> to vector<2x8x8xf32>
    %178 = vector.extract_strided_slice %172 {offsets = [0, 0, 0], sizes = [2, 8, 8], strides = [1, 1, 1]} : vector<2x8x32xf32> to vector<2x8x8xf32>
    "tpu.trace_start"() <{level = 10 : i32, message = "bqd,bkd->bqk"}> : () -> ()
    %cst_70 = arith.constant dense<0.000000e+00> : vector<2x1x8xf32>
    %179 = tpu.matmul %176, %177, %cst_70 {dimension_numbers = #tpu.dot_dimension_numbers<[2], [2], [1], [1], [0, 0, 0, 1, 1, 1], [0], [0]>} : vector<2x1x8xf32>, vector<2x8x8xf32>, vector<2x1x8xf32> -> vector<2x1x8xf32>
    "tpu.trace_stop"() : () -> ()
    %cst_71 = arith.constant 0.176776692 : f32
    %180 = vector.broadcast %cst_71 : f32 to vector<2x1x8xf32>
    %181 = arith.mulf %179, %180 : vector<2x1x8xf32>
    %cst_72 = arith.constant dense<0xFF800000> : vector<2x1xf32>
    %182 = vector.multi_reduction <maximumf>, %181, %cst_72 [2] : vector<2x1x8xf32> to vector<2x1xf32>
    %cst_73 = arith.constant 0xFF800000 : f32
    %183 = vector.broadcast %cst_73 : f32 to vector<2x1xf32>
    %184 = arith.maximumf %183, %182 : vector<2x1xf32>
    %185 = vector.shape_cast %184 : vector<2x1xf32> to vector<2x1x1xf32>
    %186 = vector.broadcast %185 : vector<2x1x1xf32> to vector<2x1x8xf32>
    %187 = arith.subf %181, %186 : vector<2x1x8xf32>
    %188 = math.exp %187 : vector<2x1x8xf32>
    %cst_74 = arith.constant dense<0.000000e+00> : vector<2x1xf32>
    %189 = vector.multi_reduction <add>, %188, %cst_74 [2] : vector<2x1x8xf32> to vector<2x1xf32>
    %190 = vector.shape_cast %189 : vector<2x1xf32> to vector<2x1x1xf32>
    %191 = vector.broadcast %190 : vector<2x1x1xf32> to vector<2x1x8xf32>
    %192 = arith.divf %188, %191 : vector<2x1x8xf32>
    "tpu.trace_start"() <{level = 10 : i32, message = "bqk,bkd->bqd"}> : () -> ()
    %cst_75 = arith.constant dense<0.000000e+00> : vector<2x1x8xf32>
    %193 = tpu.matmul %192, %178, %cst_75 {dimension_numbers = #tpu.dot_dimension_numbers<[2], [1], [1], [2], [0, 0, 0, 1, 1, 2], [0], [0]>} : vector<2x1x8xf32>, vector<2x8x8xf32>, vector<2x1x8xf32> -> vector<2x1x8xf32>
    "tpu.trace_stop"() : () -> ()
    %194 = arith.addf %176, %193 : vector<2x1x8xf32>
    %195 = vector.extract_strided_slice %175 {offsets = [0, 0, 8], sizes = [2, 1, 8], strides = [1, 1, 1]} : vector<2x1x32xf32> to vector<2x1x8xf32>
    %196 = vector.extract_strided_slice %171 {offsets = [0, 0, 8], sizes = [2, 8, 8], strides = [1, 1, 1]} : vector<2x8x32xf32> to vector<2x8x8xf32>
    %197 = vector.extract_strided_slice %172 {offsets = [0, 0, 8], sizes = [2, 8, 8], strides = [1, 1, 1]} : vector<2x8x32xf32> to vector<2x8x8xf32>
    "tpu.trace_start"() <{level = 10 : i32, message = "bqd,bkd->bqk"}> : () -> ()
    %cst_76 = arith.constant dense<0.000000e+00> : vector<2x1x8xf32>
    %198 = tpu.matmul %195, %196, %cst_76 {dimension_numbers = #tpu.dot_dimension_numbers<[2], [2], [1], [1], [0, 0, 0, 1, 1, 1], [0], [0]>} : vector<2x1x8xf32>, vector<2x8x8xf32>, vector<2x1x8xf32> -> vector<2x1x8xf32>
    "tpu.trace_stop"() : () -> ()
    %cst_77 = arith.constant 0.176776692 : f32
    %199 = vector.broadcast %cst_77 : f32 to vector<2x1x8xf32>
    %200 = arith.mulf %198, %199 : vector<2x1x8xf32>
    %cst_78 = arith.constant dense<0xFF800000> : vector<2x1xf32>
    %201 = vector.multi_reduction <maximumf>, %200, %cst_78 [2] : vector<2x1x8xf32> to vector<2x1xf32>
    %cst_79 = arith.constant 0xFF800000 : f32
    %202 = vector.broadcast %cst_79 : f32 to vector<2x1xf32>
    %203 = arith.maximumf %202, %201 : vector<2x1xf32>
    %204 = vector.shape_cast %203 : vector<2x1xf32> to vector<2x1x1xf32>
    %205 = vector.broadcast %204 : vector<2x1x1xf32> to vector<2x1x8xf32>
    %206 = arith.subf %200, %205 : vector<2x1x8xf32>
    %207 = math.exp %206 : vector<2x1x8xf32>
    %cst_80 = arith.constant dense<0.000000e+00> : vector<2x1xf32>
    %208 = vector.multi_reduction <add>, %207, %cst_80 [2] : vector<2x1x8xf32> to vector<2x1xf32>
    %209 = vector.shape_cast %208 : vector<2x1xf32> to vector<2x1x1xf32>
    %210 = vector.broadcast %209 : vector<2x1x1xf32> to vector<2x1x8xf32>
    %211 = arith.divf %207, %210 : vector<2x1x8xf32>
    "tpu.trace_start"() <{level = 10 : i32, message = "bqk,bkd->bqd"}> : () -> ()
    %cst_81 = arith.constant dense<0.000000e+00> : vector<2x1x8xf32>
    %212 = tpu.matmul %211, %197, %cst_81 {dimension_numbers = #tpu.dot_dimension_numbers<[2], [1], [1], [2], [0, 0, 0, 1, 1, 2], [0], [0]>} : vector<2x1x8xf32>, vector<2x8x8xf32>, vector<2x1x8xf32> -> vector<2x1x8xf32>
    "tpu.trace_stop"() : () -> ()
    %213 = arith.addf %195, %212 : vector<2x1x8xf32>
    %214 = vector.extract_strided_slice %175 {offsets = [0, 0, 16], sizes = [2, 1, 8], strides = [1, 1, 1]} : vector<2x1x32xf32> to vector<2x1x8xf32>
    %215 = vector.extract_strided_slice %171 {offsets = [0, 0, 16], sizes = [2, 8, 8], strides = [1, 1, 1]} : vector<2x8x32xf32> to vector<2x8x8xf32>
    %216 = vector.extract_strided_slice %172 {offsets = [0, 0, 16], sizes = [2, 8, 8], strides = [1, 1, 1]} : vector<2x8x32xf32> to vector<2x8x8xf32>
    "tpu.trace_start"() <{level = 10 : i32, message = "bqd,bkd->bqk"}> : () -> ()
    %cst_82 = arith.constant dense<0.000000e+00> : vector<2x1x8xf32>
    %217 = tpu.matmul %214, %215, %cst_82 {dimension_numbers = #tpu.dot_dimension_numbers<[2], [2], [1], [1], [0, 0, 0, 1, 1, 1], [0], [0]>} : vector<2x1x8xf32>, vector<2x8x8xf32>, vector<2x1x8xf32> -> vector<2x1x8xf32>
    "tpu.trace_stop"() : () -> ()
    %cst_83 = arith.constant 0.176776692 : f32
    %218 = vector.broadcast %cst_83 : f32 to vector<2x1x8xf32>
    %219 = arith.mulf %217, %218 : vector<2x1x8xf32>
    %cst_84 = arith.constant dense<0xFF800000> : vector<2x1xf32>
    %220 = vector.multi_reduction <maximumf>, %219, %cst_84 [2] : vector<2x1x8xf32> to vector<2x1xf32>
    %cst_85 = arith.constant 0xFF800000 : f32
    %221 = vector.broadcast %cst_85 : f32 to vector<2x1xf32>
    %222 = arith.maximumf %221, %220 : vector<2x1xf32>
    %223 = vector.shape_cast %222 : vector<2x1xf32> to vector<2x1x1xf32>
    %224 = vector.broadcast %223 : vector<2x1x1xf32> to vector<2x1x8xf32>
    %225 = arith.subf %219, %224 : vector<2x1x8xf32>
    %226 = math.exp %225 : vector<2x1x8xf32>
    %cst_86 = arith.constant dense<0.000000e+00> : vector<2x1xf32>
    %227 = vector.multi_reduction <add>, %226, %cst_86 [2] : vector<2x1x8xf32> to vector<2x1xf32>
    %228 = vector.shape_cast %227 : vector<2x1xf32> to vector<2x1x1xf32>
    %229 = vector.broadcast %228 : vector<2x1x1xf32> to vector<2x1x8xf32>
    %230 = arith.divf %226, %229 : vector<2x1x8xf32>
    "tpu.trace_start"() <{level = 10 : i32, message = "bqk,bkd->bqd"}> : () -> ()
    %cst_87 = arith.constant dense<0.000000e+00> : vector<2x1x8xf32>
    %231 = tpu.matmul %230, %216, %cst_87 {dimension_numbers = #tpu.dot_dimension_numbers<[2], [1], [1], [2], [0, 0, 0, 1, 1, 2], [0], [0]>} : vector<2x1x8xf32>, vector<2x8x8xf32>, vector<2x1x8xf32> -> vector<2x1x8xf32>
    "tpu.trace_stop"() : () -> ()
    %232 = arith.addf %214, %231 : vector<2x1x8xf32>
    %233 = vector.extract_strided_slice %175 {offsets = [0, 0, 24], sizes = [2, 1, 8], strides = [1, 1, 1]} : vector<2x1x32xf32> to vector<2x1x8xf32>
    %234 = vector.extract_strided_slice %171 {offsets = [0, 0, 24], sizes = [2, 8, 8], strides = [1, 1, 1]} : vector<2x8x32xf32> to vector<2x8x8xf32>
    %235 = vector.extract_strided_slice %172 {offsets = [0, 0, 24], sizes = [2, 8, 8], strides = [1, 1, 1]} : vector<2x8x32xf32> to vector<2x8x8xf32>
    "tpu.trace_start"() <{level = 10 : i32, message = "bqd,bkd->bqk"}> : () -> ()
    %cst_88 = arith.constant dense<0.000000e+00> : vector<2x1x8xf32>
    %236 = tpu.matmul %233, %234, %cst_88 {dimension_numbers = #tpu.dot_dimension_numbers<[2], [2], [1], [1], [0, 0, 0, 1, 1, 1], [0], [0]>} : vector<2x1x8xf32>, vector<2x8x8xf32>, vector<2x1x8xf32> -> vector<2x1x8xf32>
    "tpu.trace_stop"() : () -> ()
    %cst_89 = arith.constant 0.176776692 : f32
    %237 = vector.broadcast %cst_89 : f32 to vector<2x1x8xf32>
    %238 = arith.mulf %236, %237 : vector<2x1x8xf32>
    %cst_90 = arith.constant dense<0xFF800000> : vector<2x1xf32>
    %239 = vector.multi_reduction <maximumf>, %238, %cst_90 [2] : vector<2x1x8xf32> to vector<2x1xf32>
    %cst_91 = arith.constant 0xFF800000 : f32
    %240 = vector.broadcast %cst_91 : f32 to vector<2x1xf32>
    %241 = arith.maximumf %240, %239 : vector<2x1xf32>
    %242 = vector.shape_cast %241 : vector<2x1xf32> to vector<2x1x1xf32>
    %243 = vector.broadcast %242 : vector<2x1x1xf32> to vector<2x1x8xf32>
    %244 = arith.subf %238, %243 : vector<2x1x8xf32>
    %245 = math.exp %244 : vector<2x1x8xf32>
    %cst_92 = arith.constant dense<0.000000e+00> : vector<2x1xf32>
    %246 = vector.multi_reduction <add>, %245, %cst_92 [2] : vector<2x1x8xf32> to vector<2x1xf32>
    %247 = vector.shape_cast %246 : vector<2x1xf32> to vector<2x1x1xf32>
    %248 = vector.broadcast %247 : vector<2x1x1xf32> to vector<2x1x8xf32>
    %249 = arith.divf %245, %248 : vector<2x1x8xf32>
    "tpu.trace_start"() <{level = 10 : i32, message = "bqk,bkd->bqd"}> : () -> ()
    %cst_93 = arith.constant dense<0.000000e+00> : vector<2x1x8xf32>
    %250 = tpu.matmul %249, %235, %cst_93 {dimension_numbers = #tpu.dot_dimension_numbers<[2], [1], [1], [2], [0, 0, 0, 1, 1, 2], [0], [0]>} : vector<2x1x8xf32>, vector<2x8x8xf32>, vector<2x1x8xf32> -> vector<2x1x8xf32>
    "tpu.trace_stop"() : () -> ()
    %251 = arith.addf %233, %250 : vector<2x1x8xf32>
    %252 = tpu.concatenate %194, %213, %232, %251 in 2 : vector<2x1x8xf32>, vector<2x1x8xf32>, vector<2x1x8xf32>, vector<2x1x8xf32> -> vector<2x1x32xf32>
    %253 = vector.shape_cast %252 : vector<2x1x32xf32> to vector<2x32xf32>
    %cst_94 = arith.constant dense<0.000000e+00> : vector<2xf32>
    %254 = vector.multi_reduction <add>, %253, %cst_94 [1] : vector<2x32xf32> to vector<2xf32>
    %255 = vector.shape_cast %254 : vector<2xf32> to vector<2x1xf32>
    %cst_95 = arith.constant 3.200000e+01 : f32
    %256 = vector.broadcast %cst_95 : f32 to vector<2x1xf32>
    %257 = arith.divf %255, %256 : vector<2x1xf32>
    %258 = vector.broadcast %257 : vector<2x1xf32> to vector<2x32xf32>
    %259 = arith.subf %253, %258 : vector<2x32xf32>
    %260 = arith.mulf %259, %259 : vector<2x32xf32>
    %cst_96 = arith.constant dense<0.000000e+00> : vector<2xf32>
    %261 = vector.multi_reduction <add>, %260, %cst_96 [1] : vector<2x32xf32> to vector<2xf32>
    %262 = vector.shape_cast %261 : vector<2xf32> to vector<2x1xf32>
    %cst_97 = arith.constant 3.200000e+01 : f32
    %263 = vector.broadcast %cst_97 : f32 to vector<2x1xf32>
    %264 = arith.divf %262, %263 : vector<2x1xf32>
    %265 = vector.broadcast %257 : vector<2x1xf32> to vector<2x32xf32>
    %266 = arith.subf %253, %265 : vector<2x32xf32>
    %cst_98 = arith.constant 9.99999974E-6 : f32
    %267 = vector.broadcast %cst_98 : f32 to vector<2x1xf32>
    %268 = arith.addf %264, %267 : vector<2x1xf32>
    %269 = math.rsqrt %268 : vector<2x1xf32>
    %270 = vector.broadcast %269 : vector<2x1xf32> to vector<2x32xf32>
    %271 = arith.mulf %266, %270 : vector<2x32xf32>
    %c0_99 = arith.constant 0 : index
    %c0_100 = arith.constant 0 : index
    %272 = vector.load %arg14[%c0_99, %c0_100] : memref<32x32xf32, #tpu.memory_space<vmem>>, vector<32x32xf32>
    %cst_101 = arith.constant dense<0.000000e+00> : vector<2x32xf32>
    %273 = tpu.matmul %271, %272, %cst_101 {dimension_numbers = #tpu.dot_dimension_numbers<[1], [0], [0], [1], [0, 0, 1, 1], [], []>} : vector<2x32xf32>, vector<32x32xf32>, vector<2x32xf32> -> vector<2x32xf32>
    %c0_102 = arith.constant 0 : index
    %c0_103 = arith.constant 0 : index
    %274 = vector.load %arg15[%c0_102, %c0_103] : memref<1x32xf32, #tpu.memory_space<vmem>>, vector<1x32xf32>
    %275 = vector.broadcast %274 : vector<1x32xf32> to vector<2x32xf32>
    %276 = arith.addf %273, %275 : vector<2x32xf32>
    %277 = arith.negf %276 : vector<2x32xf32>
    %278 = math.exp %277 : vector<2x32xf32>
    %cst_104 = arith.constant 1.000000e+00 : f32
    %279 = vector.broadcast %cst_104 : f32 to vector<2x32xf32>
    %280 = arith.addf %279, %278 : vector<2x32xf32>
    %281 = arith.divf %279, %280 : vector<2x32xf32>
    %282 = arith.addf %271, %281 : vector<2x32xf32>
    %cst_105 = arith.constant dense<0.000000e+00> : vector<2xf32>
    %283 = vector.multi_reduction <add>, %282, %cst_105 [1] : vector<2x32xf32> to vector<2xf32>
    %284 = vector.shape_cast %283 : vector<2xf32> to vector<2x1xf32>
    %cst_106 = arith.constant 3.200000e+01 : f32
    %285 = vector.broadcast %cst_106 : f32 to vector<2x1xf32>
    %286 = arith.divf %284, %285 : vector<2x1xf32>
    %287 = vector.broadcast %286 : vector<2x1xf32> to vector<2x32xf32>
    %288 = arith.subf %282, %287 : vector<2x32xf32>
    %289 = arith.mulf %288, %288 : vector<2x32xf32>
    %cst_107 = arith.constant dense<0.000000e+00> : vector<2xf32>
    %290 = vector.multi_reduction <add>, %289, %cst_107 [1] : vector<2x32xf32> to vector<2xf32>
    %291 = vector.shape_cast %290 : vector<2xf32> to vector<2x1xf32>
    %cst_108 = arith.constant 3.200000e+01 : f32
    %292 = vector.broadcast %cst_108 : f32 to vector<2x1xf32>
    %293 = arith.divf %291, %292 : vector<2x1xf32>
    %294 = vector.broadcast %286 : vector<2x1xf32> to vector<2x32xf32>
    %295 = arith.subf %282, %294 : vector<2x32xf32>
    %cst_109 = arith.constant 9.99999974E-6 : f32
    %296 = vector.broadcast %cst_109 : f32 to vector<2x1xf32>
    %297 = arith.addf %293, %296 : vector<2x1xf32>
    %298 = math.rsqrt %297 : vector<2x1xf32>
    %299 = vector.broadcast %298 : vector<2x1xf32> to vector<2x32xf32>
    %300 = arith.mulf %295, %299 : vector<2x32xf32>
    %c0_110 = arith.constant 0 : index
    %c0_111 = arith.constant 0 : index
    %301 = vector.load %arg16[%c0_110, %c0_111] : memref<32x2xf32, #tpu.memory_space<vmem>>, vector<32x2xf32>
    %cst_112 = arith.constant dense<0.000000e+00> : vector<2x2xf32>
    %302 = tpu.matmul %300, %301, %cst_112 {dimension_numbers = #tpu.dot_dimension_numbers<[1], [0], [0], [1], [0, 0, 1, 1], [], []>} : vector<2x32xf32>, vector<32x2xf32>, vector<2x2xf32> -> vector<2x2xf32>
    %c0_113 = arith.constant 0 : index
    %c0_114 = arith.constant 0 : index
    %303 = vector.load %arg17[%c0_113, %c0_114] : memref<1x2xf32, #tpu.memory_space<vmem>>, vector<1x2xf32>
    %304 = vector.broadcast %303 : vector<1x2xf32> to vector<2x2xf32>
    %305 = arith.addf %302, %304 : vector<2x2xf32>
    %306 = arith.negf %305 : vector<2x2xf32>
    %307 = math.exp %306 : vector<2x2xf32>
    %cst_115 = arith.constant 1.000000e+00 : f32
    %308 = vector.broadcast %cst_115 : f32 to vector<2x2xf32>
    %309 = arith.addf %308, %307 : vector<2x2xf32>
    %310 = arith.divf %308, %309 : vector<2x2xf32>
    %c0_116 = arith.constant 0 : index
    %c0_117 = arith.constant 0 : index
    %311 = vector.load %arg18[%c0_116, %c0_117] : memref<2x2xf32, #tpu.memory_space<vmem>>, vector<2x2xf32>
    tpu.vector_store %arg18[%c0_116, %c0_117], %310 {strides = array<i32>} : memref<2x2xf32, #tpu.memory_space<vmem>>, vector<2x2xf32>,
    return
  }
}

</mosaic_0001>

<bundles_post_ra>
// kernel: quan2_forward.1
= control target key start
LH: loop header
LB: loop body
LE: loop exit
PB: predicated region body
PF: predicated region fallthrough
CT: control target
= control target key end

     0   :  { %s5080_s0 = inlined_call_operand.vmem [shape: f32[16,64], index: 0, kind: input, shape index: {}]   ;;  %s5081_s1 = inlined_call_operand.vmem [shape: f32[64,96], index: 1, kind: input, shape index: {}]   ;;  %s5082_s2 = inlined_call_operand.vmem [shape: f32[1,96], index: 2, kind: input, shape index: {}]   ;;  %s5083_s3 = inlined_call_operand.vmem [shape: f32[96,32], index: 3, kind: input, shape index: {}]   ;;  %s5084_s4 = inlined_call_operand.vmem [shape: f32[1,32], index: 4, kind: input, shape index: {}]   ;;  %s5085_s5 = inlined_call_operand.vmem [shape: f32[32,96], index: 5, kind: input, shape index: {}]   ;;  %s5086_s6 = inlined_call_operand.vmem [shape: f32[1,96], index: 6, kind: input, shape index: {}]   ;;  %s5087_s7 = inlined_call_operand.vmem [shape: f32[32,32], index: 7, kind: input, shape index: {}]   ;;  %s5088_s8 = inlined_call_operand.vmem [shape: f32[1,32], index: 8, kind: input, shape index: {}]   ;;  %s5089_s9 = inlined_call_operand.vmem [shape: f32[1,32], index: 9, kind: input, shape index: {}]   ;;  %s5090_s10 = inlined_call_operand.vmem [shape: f32[32,32], index: 10, kind: input, shape index: {}]   ;;  %s5091_s11 = inlined_call_operand.vmem [shape: f32[1,32], index: 11, kind: input, shape index: {}]   ;;  %s5092_s12 = inlined_call_operand.vmem [shape: f32[32,64], index: 12, kind: input, shape index: {}]   ;;  %s5093_s13 = inlined_call_operand.vmem [shape: f32[1,64], index: 13, kind: input, shape index: {}]   ;;  %s5094_s14 = inlined_call_operand.vmem [shape: f32[32,32], index: 14, kind: input, shape index: {}]   ;;  %s5095_s15 = inlined_call_operand.vmem [shape: f32[1,32], index: 15, kind: input, shape index: {}]   ;;  %s5096_s16 = inlined_call_operand.vmem [shape: f32[32,2], index: 16, kind: input, shape index: {}]   ;;  %s5097_s17 = inlined_call_operand.vmem [shape: f32[1,2], index: 17, kind: input, shape index: {}]   ;;  %s5098_s18 = inlined_call_operand.hbm [shape: f32[2,2], index: 18, kind: output, shape index: {}]  }
   0x1   :  { %5101 = sst [smem:[#allocation5_spill]] %s5080_s0 }
   0x2   :  { %5102 = sst [smem:[#allocation6_spill]] %s5081_s1 }
   0x3   :  { %5103 = sst [smem:[#allocation7_spill]] %s5082_s2 }
   0x4   :  { %s5104_s29 = sld [smem:[#allocation6_spill]]  ;;  %vm77_vm0 = vcmask 523264   ;;  %s5105_s27 = sld [smem:[#allocation5_spill]] }
   0xa   :  { %v62_v0 = vld [vmem:[%s5104_s29] sm:$0xff]  ;;  %v63_v1 = vld [vmem:[%s5104_s29 + $0x8] sm:$0xff]  ;;  %v64_v2 = vld [vmem:[%s5104_s29 + $0x10] sm:$0xff] }
   0xb   :  { %v4183_v3 = vpack.c.bf16 %v63_v1, %v62_v0  ;;  %v65_v4 = vld [vmem:[%s5104_s29 + $0x18] sm:$0xff]  ;;  %v66_v6 = vld [vmem:[%s5104_s29 + $0x20] sm:$0xff]  ;;  %v67_v7 = vld [vmem:[%s5104_s29 + $0x28] sm:$0xff] }
   0xc   :  { %v4187_v5 = vpack.c.bf16 %v65_v4, %v64_v2  ;;  %v60_v8 = vld [vmem:[%s5105_s27] sm:$0xff] }
   0xd   :  { %4184 = vmatprep.subr.bf16.mxu0 %v4183_v3  ;;  %3927 = vmatprep.mubr.msk.f32.mxu0 %vm77_vm0, %v60_v8 }
   0xe   :  { %23 = vsyncpa [#allocation3], 0  ;;  %4186 = vmatpush3.bf16.msra.mxu0 %v4183_v3  ;;  %v4191_v9 = vpack.c.bf16 %v67_v7, %v66_v6  ;;  %v68_v10 = vld [vmem:[%s5104_s29 + $0x30] sm:$0xff]  ;;  %v69_v11 = vld [vmem:[%s5104_s29 + $0x38] sm:$0xff]  ;;  %s5106_s0 = sld [smem:[#allocation7_spill]]  ;;  %vm190_vm1 = vcmask 785408  }
   0xf   :  { %4188 = vmatprep.subr.bf16.mxu0 %v4187_v5  ;;  %v4195_v12 = vpack.c.bf16 %v69_v11, %v68_v10  ;;  %v61_v13 = vld [vmem:[%s5105_s27 + $0x8] sm:$0xff]  ;;  %v171_v14 = vld [vmem:[%s5083_s3] sm:$0xff]  ;;  %v173_v17 = vld [vmem:[%s5083_s3 + $0x10] sm:$0xff]  ;;  %vm295_vm2 = vcmask 261120   ;;  %v4423_v0 = vmov 0.0   ;;  %vm4424_vm3 = vmmov 0  }
  0x10   :  { %v172_v15 = vld [vmem:[%s5083_s3 + $0x8] sm:$0xff]  ;;  %v174_v18 = vld [vmem:[%s5083_s3 + $0x18] sm:$0xff]  ;;  %v175_v20 = vld [vmem:[%s5083_s3 + $0x20] sm:$0xff]  ;;  %s4425_s25 = smov 96   ;;  %vm380_vm4 = vcmask 64512   ;;  %s4427_s26 = smov 88  }
  0x11   :  { %v4199_v16 = vpack.c.bf16 %v172_v15, %v171_v14  ;;  %v4203_v19 = vpack.c.bf16 %v174_v18, %v173_v17  ;;  %v176_v21 = vld [vmem:[%s5083_s3 + $0x28] sm:$0xff]  ;;  %v177_v23 = vld [vmem:[%s5083_s3 + $0x30] sm:$0xff]  ;;  %v178_v24 = vld [vmem:[%s5083_s3 + $0x38] sm:$0xff]  ;;  %s4428_s27 = smov 120   ;;  %s4429_s28 = smov 56   ;;  %vm1738_vm5 = vcmask 130048  }
  0x12   :  { %4190 = vmatpush3.bf16.msra.mxu0 %v4187_v5  ;;  %v4207_v22 = vpack.c.bf16 %v176_v21, %v175_v20  ;;  %v4211_v25 = vpack.c.bf16 %v178_v24, %v177_v23  ;;  %v179_v26 = vld [vmem:[%s5083_s3 + $0x40] sm:$0xff]  ;;  %v180_v27 = vld [vmem:[%s5083_s3 + $0x48] sm:$0xff]  ;;  %v181_v28 = vld [vmem:[%s5083_s3 + $0x50] sm:$0xff]  ;;  %s4430_s30 = smov 80   ;;  %s4433_s19 = smov 72   ;;  %vm1741_vm6 = vcmask 195584  }
  0x13   :  { %4192 = vmatprep.subr.bf16.mxu0 %v4191_v9  ;;  %4200 = vmatprep.subr.bf16.mxu1 %v4199_v16  ;;  %v4215_v29 = vpack.c.bf16 %v180_v27, %v179_v26  ;;  %v182_v30 = vld [vmem:[%s5083_s3 + $0x58] sm:$0xff]  ;;  %v284_v45 = vld [vmem:[%s5085_s5] sm:$0xff]  ;;  %v285_v46 = vld [vmem:[%s5085_s5 + $0x8] sm:$0xff]  ;;  %s4432_s3 = smov 48   ;;  %s4434_s1 = smov 104   ;;  %vm2237_vm7 = vcmask 57344  }
  0x14   :  { %4202 = vmatpush3.bf16.msra.mxu1 %v4199_v16  ;;  %v4219_v31 = vpack.c.bf16 %v182_v30, %v181_v28  ;;  %v3712_v32 = vld [vmem:[%s5106_s0] ss:$0 sm:$0xff]  ;;  %v286_v47 = vld [vmem:[%s5085_s5 + $0x10] sm:$0xff]  ;;  %v4223_v48 = vpack.c.bf16 %v285_v46, %v284_v45  ;;  %v287_v49 = vld [vmem:[%s5085_s5 + $0x18] sm:$0xff]  ;;  %s4431_s0 = smov 112   ;;  %s4435_s20 = smov 40  }
  0x15   :  { %4204 = vmatprep.subr.bf16.mxu1 %v4203_v19  ;;  %v4227_v50 = vpack.c.bf16 %v287_v49, %v286_v47  ;;  %v3717_v51 = vld [vmem:[%s5084_s4] ss:$0 sm:$0xff]  ;;  %s4436_s21 = smov 8   ;;  %s4437_s22 = smov 16   ;;  %vm3437_vm8 = vcmask 1041409   ;;  %vm3440_vm9 = vcmask 254976  }
  0x16   :  { %4194 = vmatpush3.bf16.msra.mxu0 %v4191_v9  ;;  %v3722_v1 = vld [vmem:[%s5086_s6] ss:$0 sm:$0xff]  ;;  %s4426_s6 = smov 64   ;;  %s4438_s2 = smov 24   ;;  %vm3696_vm10 = vcmask 9216  }
  0x17   :  { %4196 = vmatprep.subr.bf16.mxu0 %v4195_v12  ;;  %s4440_s23 = smov [#allocation2]  }
  0x18   :  { %4206 = vmatpush3.bf16.msra.mxu1 %v4203_v19  ;;  %s3704_s29 = sshll.u32 %s4440_s23, 4  ;;  %s3705_s29 = int_to_ptr.vmem [resolvable:$true] %s3704_s29 }
  0x19   :  { %4208 = vmatprep.subr.bf16.mxu1 %v4207_v22  ;;  %s4399_s24 = scalar_lea.vmem %s3705_s29, 32  ;;  %p4404_p1 = scmp.lt.s32.totalorder %s3705_s29, %s3705_s29 }
  0x1a   :  { %4198 = vmatpush3.bf16.msra.mxu0 %v4195_v12  ;;  %p4400_p0 = scmp.ne.s32.totalorder %s3705_s29, %s4399_s24  ;;  %p4405_p2 = scmp.lt.s32.totalorder %s4399_s24, %s4399_s24 }
  0x1b   :  { %4224 = vmatprep.subr.bf16.mxu0 %v4223_v48 }
  0x1c   :  { %4210 = vmatpush3.bf16.msra.mxu1 %v4207_v22  ;;  %p4406_p3 = por %p4405_p2, %p4404_p1 }
  0x1d   :  { %3928 = vmatmul.mubr.msk.f32.vlgmr.msra.gmra.mrb[0].mxu0 %vm77_vm0, %v61_v13  ;;  %4212 = vmatprep.subr.bf16.mxu1 %v4211_v25 }
  0x1e   :  { %4226 = vmatpush3.bf16.msra.mxu0 %v4223_v48  ;;  %p4407_p4 = pnand %p4406_p3, %p4400_p0 }
  0x1f   :  { %4228 = vmatprep.subr.bf16.mxu0 %v4227_v50 }
  0x20   :  { %4214 = vmatpush3.bf16.msra.mxu1 %v4211_v25 }
  0x21   :  { %4216 = vmatprep.subr.bf16.mxu1 %v4215_v29 }
  0x22   :  { %4230 = vmatpush3.bf16.msra.mxu0 %v4227_v50 }
  0x23   :  { %3968 = vmatprep.subr.mxu0 %v4423_v0 }
  0x24   :  { %4218 = vmatpush3.bf16.msra.mxu1 %v4215_v29 }
  0x25   :  { %4220 = vmatprep.subr.bf16.mxu1 %v4219_v31 }
  0x28   :  { %4222 = vmatpush3.bf16.msra.mxu1 %v4219_v31 }
  0x29   :  { %3973 = vmatprep.subr.mxu1 %v4423_v0 }
  0xf0   :  { %v3929_v33 = vpop.f32.mrb[0].mxu0 }
  0xf1   :  { %v156_v34 = vadd.f32 %v3929_v33, %v3712_v32  ;;  %v150_v35 = vpop.f32.mrb[1].mxu0 }
  0xf2   :  { %v151_v36 = vadd.f32 %v3712_v32, %v150_v35 }
  0xf3   :  { %v3716_v37 = vmul.f32 -1.442695, %v156_v34 }
  0xf4   :  { %v3715_v38 = vmul.f32 -1.442695, %v151_v36 }
  0xf5   :  { %4283 = vpow2.f32 %v3716_v37 }
  0xf6   :  { %4285 = vpow2.f32 %v3715_v38 }
  0xff   :  { %v4284_v39 = vpop.eup %4283 }
 0x100   :  { %v4286_v40 = vpop.eup %4285  ;;  %v166_v41 = vadd.f32 1.0, %v4284_v39 }
 0x101   :  { %v165_v42 = vadd.f32 1.0, %v4286_v40 }
 0x103   :  { %4287 = vrcp.f32 %v165_v42 }
 0x104   :  { %4289 = vrcp.f32 %v166_v41 }
 0x10d   :  { %v4288_v43 = vpop.eup %4287 }
 0x10e   :  { %v4290_v44 = vpop.eup %4289  ;;  %3954 = vmatprep.mubr.msk.f32.mxu1 %vm190_vm1, %v4288_v43 }
 0x10f   :  { %3955 = vmatmul.mubr.msk.f32.vlgmr.msra.gmra.mrb[0].mxu1 %vm190_vm1, %v4290_v44 }
 0x110   :  { %3975 = vmatprep.mubr.msk.f32.mxu1 %vm4424_vm3, %v4423_v0 }
 0x1e2   :  { %v3956_v52 = vpop.f32.mrb[0].mxu1 }
 0x1e3   :  { %v269_v53 = vadd.f32 %v3956_v52, %v3717_v51  ;;  %v263_v54 = vpop.f32.mrb[1].mxu1 }
 0x1e4   :  { %v264_v55 = vadd.f32 %v3717_v51, %v263_v54 }
 0x1e5   :  { %v3721_v56 = vmul.f32 -1.442695, %v269_v53 }
 0x1e6   :  { %v3720_v57 = vmul.f32 -1.442695, %v264_v55 }
 0x1e7   :  { %4291 = vpow2.f32 %v3721_v56 }
 0x1e8   :  { %4293 = vpow2.f32 %v3720_v57 }
 0x1f1   :  { %v4292_v58 = vpop.eup %4291 }
 0x1f2   :  { %v4294_v59 = vpop.eup %4293  ;;  %v279_v60 = vadd.f32 1.0, %v4292_v58 }
 0x1f3   :  { %v278_v61 = vadd.f32 1.0, %v4294_v59 }
 0x1f5   :  { %4295 = vrcp.f32 %v278_v61 }
 0x1f6   :  { %4297 = vrcp.f32 %v279_v60 }
 0x1ff   :  { %v4296_v62 = vpop.eup %4295 }
 0x200   :  { %v4298_v63 = vpop.eup %4297  ;;  %3965 = vmatprep.mubr.msk.f32.mxu0 %vm295_vm2, %v4296_v62 }
 0x201   :  { %3966 = vmatmul.mubr.msk.f32.vlgmr.msra.gmra.mrb[2].mxu0 %vm295_vm2, %v4298_v63 }
 0x202   :  { %3970 = vmatprep.mubr.msk.f32.mxu0 %vm4424_vm3, %v4423_v0 }
 0x2d4   :  { %v3967_v2 = vpop.f32.mrb[2].mxu0 }
 0x2d5   :  { %v368_v3 = vpop.f32.mrb[3].mxu0  ;;  %v4637_v5 = vadd.f32 %v3967_v2, %v3722_v1 }
 0x2d6   :  { %v4633_v4 = vadd.f32 %v3722_v1, %v368_v3 }
 0x2d8   :  { %378 = vrot.lane.b32.xlu0 %v4633_v4, %s4425_s25 }
 0x2dc   :  { %456 = vrot.lane.b32.xlu0 %v4637_v5, %s4425_s25 }
 0x34a   :  { %v379_v6 = vpop.permute.xlu0 %378 }
 0x34b   :  { %3969 = vmatpush3.xpose.msk.msra.mxu0 %vm380_vm4, %v379_v6 }
 0x34c   :  { %3978 = vmatprep.subr.mxu0 %v4423_v0 }
 0x34e   :  { %3971 = vmatmul.mubr.msk.f32.vlgmr.msra.gmra.mrb[4].mxu0 %vm380_vm4, %v4633_v4  ;;  %v457_v7 = vpop.permute.xlu0 %456 }
 0x34f   :  { %3974 = vmatpush3.xpose.msk.msra.mxu1 %vm380_vm4, %v457_v7  ;;  %3980 = vmatprep.mubr.msk.f32.mxu0 %vm4424_vm3, %v4423_v0 }
 0x350   :  { %3983 = vmatprep.subr.mxu1 %v4423_v0 }
 0x352   :  { %3976 = vmatmul.mubr.msk.f32.vlgmr.msra.gmra.mrb[2].mxu1 %vm380_vm4, %v4637_v5 }
 0x353   :  { %3985 = vmatprep.mubr.msk.f32.mxu1 %vm4424_vm3, %v4423_v0 }
 0x421   :  { %v451_v8 = vpop.f32.mrb[4].mxu0 }
 0x422   :  { %v532_v9 = vmul.f32 0.17677669, %v451_v8  ;;  %v3972_v10 = vpop.f32.mrb[5].mxu0 }
 0x424   :  { %v534_v11 = vsel %vm380_vm4, %v532_v9, -inf }
 0x425   :  { %535 = vmax.xlane.f32.xlu1 %v534_v11  ;;  %v528_v12 = vpop.f32.mrb[2].mxu1 }
 0x426   :  { %v533_v13 = vmul.f32 0.17677669, %v528_v12  ;;  %v3977_v14 = vpop.f32.mrb[3].mxu1 }
 0x428   :  { %v537_v15 = vsel %vm380_vm4, %v533_v13, -inf }
 0x429   :  { %538 = vmax.xlane.f32.xlu1 %v537_v15 }
 0x43a   :  { %556 = vrot.lane.b32.xlu1 %v4633_v4, %s4426_s6 }
 0x43e   :  { %632 = vrot.lane.b32.xlu1 %v4637_v5, %s4426_s6 }
 0x442   :  { %712 = vrot.lane.b32.xlu1 %v4633_v4, %s4427_s26 }
 0x446   :  { %790 = vrot.lane.b32.xlu1 %v4637_v5, %s4427_s26 }
 0x4b2   :  { %v536_v16 = vpop.xlane.xlu1 %535 }
 0x4b3   :  { %v540_v17 = vsub.f32 %v532_v9, %v536_v16 }
 0x4b5   :  { %v542_v18 = vmul.f32 1.442695, %v540_v17 }
 0x4b6   :  { %v539_v19 = vpop.xlane.xlu1 %538 }
 0x4b7   :  { %4299 = vpow2.f32 %v542_v18  ;;  %v541_v20 = vsub.f32 %v533_v13, %v539_v19 }
 0x4b9   :  { %v544_v21 = vmul.f32 1.442695, %v541_v20 }
 0x4ba   :  { %v557_v22 = vpop.permute.xlu1 %556 }
 0x4bb   :  { %4301 = vpow2.f32 %v544_v21  ;;  %3979 = vmatpush3.msra.mxu0 %v557_v22 }
 0x4bc   :  { %3988 = vmatprep.subr.mxu0 %v4423_v0 }
 0x4be   :  { %v633_v23 = vpop.permute.xlu1 %632 }
 0x4bf   :  { %3984 = vmatpush3.msra.mxu1 %v633_v23 }
 0x4c0   :  { %3993 = vmatprep.subr.mxu1 %v4423_v0 }
 0x4c1   :  { %v4300_v24 = vpop.eup %4299 }
 0x4c2   :  { %v546_v25 = vsel %vm380_vm4, %v4300_v24, 0.0  ;;  %v713_v28 = vpop.permute.xlu1 %712 }
 0x4c3   :  { %547 = vadd.xlane.f32.xlu0 %v546_v25 }
 0x4c5   :  { %v4302_v26 = vpop.eup %4301 }
 0x4c6   :  { %v549_v27 = vsel %vm380_vm4, %v4302_v26, 0.0  ;;  %v791_v29 = vpop.permute.xlu1 %790 }
 0x4c7   :  { %550 = vadd.xlane.f32.xlu1 %v549_v27 }
 0x4d8   :  { %788 = vrot.lane.b32.xlu1 %v4637_v5, %s4428_s27 }
 0x4d9   :  { %710 = vrot.lane.b32.xlu0 %v4633_v4, %s4428_s27 }
 0x550   :  { %v548_v30 = vpop.xlane.xlu0 %547 }
 0x551   :  { %4303 = vrcp.f32 %v548_v30 }
 0x554   :  { %v551_v31 = vpop.xlane.xlu1 %550  ;;  %v711_v36 = vpop.permute.xlu0 %710 }
 0x555   :  { %4305 = vrcp.f32 %v551_v31 }
 0x558   :  { %v789_v37 = vpop.permute.xlu1 %788 }
 0x55b   :  { %v4304_v32 = vpop.eup %4303 }
 0x55c   :  { %v553_v33 = vmul.f32 %v4304_v32, %v4300_v24 }
 0x55e   :  { %3981 = vmatmul.mubr.msk.f32.vlgmr.msra.gmra.mrb[6].mxu0 %vm380_vm4, %v553_v33 }
 0x55f   :  { %v4306_v34 = vpop.eup %4305  ;;  %3989 = vmatpush3.xpose.msk.msra.mxu0 %vm380_vm4, %v713_v28  ;;  %3990 = vmatprep.mubr.msk.f32.mxu0 %vm4424_vm3, %v4423_v0 }
 0x560   :  { %v555_v35 = vmul.f32 %v4306_v34, %v4302_v26  ;;  %3998 = vmatprep.subr.mxu0 %v4423_v0 }
 0x562   :  { %3986 = vmatmul.mubr.msk.f32.vlgmr.msra.gmra.mrb[4].mxu1 %vm380_vm4, %v555_v35  ;;  %3991 = vmatmul.mubr.msk.f32.vlgmr.msra.gmra.mrb[8].mxu0 %vm380_vm4, %v711_v36 }
 0x563   :  { %3994 = vmatpush3.xpose.msk.msra.mxu1 %vm380_vm4, %v791_v29  ;;  %3995 = vmatprep.mubr.msk.f32.mxu1 %vm4424_vm3, %v4423_v0 }
 0x564   :  { %4003 = vmatprep.subr.mxu1 %v4423_v0  ;;  %4000 = vmatprep.mubr.msk.f32.mxu0 %vm4424_vm3, %v4423_v0 }
 0x566   :  { %3996 = vmatmul.mubr.msk.f32.vlgmr.msra.gmra.mrb[6].mxu1 %vm380_vm4, %v789_v37 }
 0x567   :  { %4005 = vmatprep.mubr.msk.f32.mxu1 %vm4424_vm3, %v4423_v0 }
 0x631   :  { %v4685_v38 = vpop.f32.mrb[6].mxu0 }
 0x632   :  { %v3982_v39 = vpop.f32.mrb[7].mxu0 }
 0x635   :  { %v4687_v40 = vpop.f32.mrb[4].mxu1  ;;  %v784_v41 = vpop.f32.mrb[8].mxu0 }
 0x636   :  { %v866_v42 = vmul.f32 0.17677669, %v784_v41  ;;  %v3987_v43 = vpop.f32.mrb[5].mxu1  ;;  %v3992_v44 = vpop.f32.mrb[9].mxu0 }
 0x638   :  { %v868_v45 = vsel %vm380_vm4, %v866_v42, -inf }
 0x639   :  { %v862_v46 = vpop.f32.mrb[6].mxu1  ;;  %869 = vmax.xlane.f32.xlu1 %v868_v45 }
 0x63a   :  { %v867_v47 = vmul.f32 0.17677669, %v862_v46  ;;  %v3997_v48 = vpop.f32.mrb[7].mxu1 }
 0x63c   :  { %v871_v49 = vsel %vm380_vm4, %v867_v47, -inf }
 0x63d   :  { %872 = vmax.xlane.f32.xlu0 %v871_v49 }
 0x64a   :  { %890 = vrot.lane.b32.xlu1 %v4633_v4, %s4429_s28 }
 0x64e   :  { %1054 = vrot.lane.b32.xlu1 %v4633_v4, %s4430_s30 }
 0x652   :  { %1132 = vrot.lane.b32.xlu1 %v4637_v5, %s4430_s30 }
 0x653   :  { %966 = vrot.lane.b32.xlu0 %v4637_v5, %s4429_s28 }
 0x657   :  { %1052 = vrot.lane.b32.xlu0 %v4633_v4, %s4431_s0 }
 0x6c6   :  { %v870_v50 = vpop.xlane.xlu1 %869 }
 0x6c7   :  { %v874_v51 = vsub.f32 %v866_v42, %v870_v50 }
 0x6c9   :  { %v876_v55 = vmul.f32 1.442695, %v874_v51 }
 0x6ca   :  { %v891_v52 = vpop.permute.xlu1 %890  ;;  %v873_v53 = vpop.xlane.xlu0 %872 }
 0x6cb   :  { %v875_v54 = vsub.f32 %v867_v47, %v873_v53  ;;  %3999 = vmatpush3.msra.mxu0 %v891_v52 }
 0x6cc   :  { %4008 = vmatprep.subr.mxu0 %v4423_v0 }
 0x6cd   :  { %v878_v56 = vmul.f32 1.442695, %v875_v54 }
 0x6ce   :  { %v967_v57 = vpop.permute.xlu0 %966  ;;  %v1055_v62 = vpop.permute.xlu1 %1054 }
 0x6cf   :  { %4307 = vpow2.f32 %v878_v56  ;;  %4004 = vmatpush3.msra.mxu1 %v967_v57 }
 0x6d0   :  { %4013 = vmatprep.subr.mxu1 %v4423_v0  ;;  %4309 = vpow2.f32 %v876_v55 }
 0x6d2   :  { %v1133_v63 = vpop.permute.xlu1 %1132  ;;  %v1053_v10 = vpop.permute.xlu0 %1052 }
 0x6d9   :  { %v4308_v58 = vpop.eup %4307 }
 0x6da   :  { %v883_v59 = vsel %vm380_vm4, %v4308_v58, 0.0  ;;  %v4310_v60 = vpop.eup %4309 }
 0x6db   :  { %884 = vadd.xlane.f32.xlu1 %v883_v59  ;;  %v880_v61 = vsel %vm380_vm4, %v4310_v60, 0.0 }
 0x6df   :  { %881 = vadd.xlane.f32.xlu1 %v880_v61 }
 0x6f0   :  { %1130 = vrot.lane.b32.xlu1 %v4637_v5, %s4431_s0 }
 0x768   :  { %v885_v1 = vpop.xlane.xlu1 %884 }
 0x769   :  { %4311 = vrcp.f32 %v885_v1 }
 0x76c   :  { %v882_v2 = vpop.xlane.xlu1 %881 }
 0x76d   :  { %4313 = vrcp.f32 %v882_v2 }
 0x770   :  { %v1131_v9 = vpop.permute.xlu1 %1130 }
 0x773   :  { %v4312_v3 = vpop.eup %4311 }
 0x774   :  { %v889_v6 = vmul.f32 %v4312_v3, %v4308_v58 }
 0x776   :  { %4006 = vmatmul.mubr.msk.f32.vlgmr.msra.gmra.mrb[8].mxu1 %vm380_vm4, %v889_v6 }
 0x777   :  { %v4314_v7 = vpop.eup %4313  ;;  %4014 = vmatpush3.xpose.msk.msra.mxu1 %vm380_vm4, %v1133_v63  ;;  %4015 = vmatprep.mubr.msk.f32.mxu1 %vm4424_vm3, %v4423_v0 }
 0x778   :  { %v887_v8 = vmul.f32 %v4314_v7, %v4310_v60  ;;  %4023 = vmatprep.subr.mxu1 %v4423_v0 }
 0x77a   :  { %4001 = vmatmul.mubr.msk.f32.vlgmr.msra.gmra.mrb[10].mxu0 %vm380_vm4, %v887_v8  ;;  %4016 = vmatmul.mubr.msk.f32.vlgmr.msra.gmra.mrb[10].mxu1 %vm380_vm4, %v1131_v9 }
 0x77b   :  { %4009 = vmatpush3.xpose.msk.msra.mxu0 %vm380_vm4, %v1055_v62  ;;  %4010 = vmatprep.mubr.msk.f32.mxu0 %vm4424_vm3, %v4423_v0 }
 0x77c   :  { %4018 = vmatprep.subr.mxu0 %v4423_v0  ;;  %4025 = vmatprep.mubr.msk.f32.mxu1 %vm4424_vm3, %v4423_v0 }
 0x77e   :  { %4011 = vmatmul.mubr.msk.f32.vlgmr.msra.gmra.mrb[12].mxu0 %vm380_vm4, %v1053_v10 }
 0x77f   :  { %4020 = vmatprep.mubr.msk.f32.mxu0 %vm4424_vm3, %v4423_v0 }
 0x849   :  { %v4721_v11 = vpop.f32.mrb[8].mxu1 }
 0x84a   :  { %v4007_v12 = vpop.f32.mrb[9].mxu1 }
 0x84d   :  { %v4723_v13 = vpop.f32.mrb[10].mxu0  ;;  %v1204_v14 = vpop.f32.mrb[10].mxu1 }
 0x84e   :  { %v1209_v15 = vmul.f32 0.17677669, %v1204_v14  ;;  %v4002_v16 = vpop.f32.mrb[11].mxu0  ;;  %v4017_v17 = vpop.f32.mrb[11].mxu1 }
 0x850   :  { %v1213_v18 = vsel %vm380_vm4, %v1209_v15, -inf }
 0x851   :  { %1214 = vmax.xlane.f32.xlu1 %v1213_v18  ;;  %v1126_v19 = vpop.f32.mrb[12].mxu0 }
 0x852   :  { %v1208_v20 = vmul.f32 0.17677669, %v1126_v19  ;;  %v4012_v21 = vpop.f32.mrb[13].mxu0 }
 0x854   :  { %v1210_v22 = vsel %vm380_vm4, %v1208_v20, -inf }
 0x855   :  { %1211 = vmax.xlane.f32.xlu0 %v1210_v22 }
 0x862   :  { %1232 = vrot.lane.b32.xlu1 %v4633_v4, %s4432_s3 }
 0x866   :  { %1396 = vrot.lane.b32.xlu1 %v4633_v4, %s4433_s19 }
 0x86a   :  { %1474 = vrot.lane.b32.xlu1 %v4637_v5, %s4433_s19 }
 0x86b   :  { %1308 = vrot.lane.b32.xlu0 %v4637_v5, %s4432_s3 }
 0x86e   :  { %1472 = vrot.lane.b32.xlu1 %v4637_v5, %s4434_s1 }
 0x8de   :  { %v1215_v23 = vpop.xlane.xlu1 %1214 }
 0x8df   :  { %v1217_v24 = vsub.f32 %v1209_v15, %v1215_v23 }
 0x8e1   :  { %v1220_v25 = vmul.f32 1.442695, %v1217_v24 }
 0x8e2   :  { %v1233_v26 = vpop.permute.xlu1 %1232  ;;  %v1212_v27 = vpop.xlane.xlu0 %1211 }
 0x8e3   :  { %4315 = vpow2.f32 %v1220_v25  ;;  %v1216_v28 = vsub.f32 %v1208_v20, %v1212_v27  ;;  %4019 = vmatpush3.msra.mxu0 %v1233_v26  ;;  %v709_v25 = vadd.f32 %v4687_v40, %v4637_v5 }
 0x8e4   :  { %4028 = vmatprep.subr.mxu0 %v4423_v0 }
 0x8e5   :  { %v1218_v29 = vmul.f32 1.442695, %v1216_v28 }
 0x8e6   :  { %v1309_v30 = vpop.permute.xlu0 %1308  ;;  %v1397_v37 = vpop.permute.xlu1 %1396 }
 0x8e7   :  { %4317 = vpow2.f32 %v1218_v29  ;;  %4024 = vmatpush3.msra.mxu1 %v1309_v30 }
 0x8e8   :  { %4033 = vmatprep.subr.mxu1 %v4423_v0 }
 0x8ea   :  { %v1475_v41 = vpop.permute.xlu1 %1474 }
 0x8ed   :  { %v4316_v31 = vpop.eup %4315 }
 0x8ee   :  { %v1225_v32 = vsel %vm380_vm4, %v4316_v31, 0.0  ;;  %v1473_v45 = vpop.permute.xlu1 %1472 }
 0x8ef   :  { %1226 = vadd.xlane.f32.xlu0 %v1225_v32 }
 0x8f1   :  { %v4318_v33 = vpop.eup %4317 }
 0x8f2   :  { %v1222_v34 = vsel %vm380_vm4, %v4318_v33, 0.0 }
 0x8f3   :  { %1223 = vadd.xlane.f32.xlu0 %v1222_v34 }
 0x909   :  { %1394 = vrot.lane.b32.xlu0 %v4633_v4, %s4434_s1 }
 0x97c   :  { %v1227_v35 = vpop.xlane.xlu0 %1226 }
 0x97d   :  { %4319 = vrcp.f32 %v1227_v35 }
 0x980   :  { %v1224_v36 = vpop.xlane.xlu0 %1223 }
 0x981   :  { %4321 = vrcp.f32 %v1224_v36 }
 0x984   :  { %v1395_v46 = vpop.permute.xlu0 %1394 }
 0x987   :  { %v4320_v39 = vpop.eup %4319 }
 0x988   :  { %v1231_v42 = vmul.f32 %v4320_v39, %v4316_v31 }
 0x98a   :  { %4026 = vmatmul.mubr.msk.f32.vlgmr.msra.gmra.mrb[12].mxu1 %vm380_vm4, %v1231_v42 }
 0x98b   :  { %v4322_v43 = vpop.eup %4321  ;;  %4034 = vmatpush3.xpose.msk.msra.mxu1 %vm380_vm4, %v1475_v41  ;;  %4035 = vmatprep.mubr.msk.f32.mxu1 %vm4424_vm3, %v4423_v0 }
 0x98c   :  { %v1229_v44 = vmul.f32 %v4322_v43, %v4318_v33  ;;  %4043 = vmatprep.subr.mxu1 %v4423_v0  ;;  %v708_v33 = vadd.f32 %v4685_v38, %v4633_v4 }
 0x98e   :  { %4021 = vmatmul.mubr.msk.f32.vlgmr.msra.gmra.mrb[14].mxu0 %vm380_vm4, %v1229_v44  ;;  %4036 = vmatmul.mubr.msk.f32.vlgmr.msra.gmra.mrb[14].mxu1 %vm380_vm4, %v1473_v45 }
 0x98f   :  { %4029 = vmatpush3.xpose.msk.msra.mxu0 %vm380_vm4, %v1397_v37  ;;  %4030 = vmatprep.mubr.msk.f32.mxu0 %vm4424_vm3, %v4423_v0 }
 0x990   :  { %4038 = vmatprep.subr.mxu0 %v4423_v0  ;;  %4045 = vmatprep.mubr.msk.f32.mxu1 %vm4424_vm3, %v4423_v0 }
 0x992   :  { %4031 = vmatmul.mubr.msk.f32.vlgmr.msra.gmra.mrb[16].mxu0 %vm380_vm4, %v1395_v46 }
 0x993   :  { %4040 = vmatprep.mubr.msk.f32.mxu0 %vm4424_vm3, %v4423_v0 }
 0xa5d   :  { %v1380_v47 = vpop.f32.mrb[12].mxu1 }
 0xa5e   :  { %v4027_v48 = vpop.f32.mrb[13].mxu1 }
 0xa61   :  { %v1304_v49 = vpop.f32.mrb[14].mxu0  ;;  %v1546_v50 = vpop.f32.mrb[14].mxu1 }
 0xa62   :  { %v1551_v51 = vmul.f32 0.17677669, %v1546_v50  ;;  %v4022_v52 = vpop.f32.mrb[15].mxu0  ;;  %v4037_v53 = vpop.f32.mrb[15].mxu1  ;;  %v1771_v50 = vld [vmem:[%s5087_s7] sm:$0xff] }
 0xa63   :  { %v1773_v52 = vld [vmem:[%s5087_s7 + $0x10] sm:$0xff] }
 0xa64   :  { %v1555_v54 = vsel %vm380_vm4, %v1551_v51, -inf }
 0xa65   :  { %1556 = vmax.xlane.f32.xlu1 %v1555_v54  ;;  %v1468_v55 = vpop.f32.mrb[16].mxu0  ;;  %v1774_v54 = vld [vmem:[%s5087_s7 + $0x18] sm:$0xff] }
 0xa66   :  { %v1550_v56 = vmul.f32 0.17677669, %v1468_v55  ;;  %v4032_v57 = vpop.f32.mrb[17].mxu0  ;;  %v4235_v55 = vpack.c.bf16 %v1774_v54, %v1773_v52 }
 0xa68   :  { %v1552_v58 = vsel %vm380_vm4, %v1550_v56, -inf }
 0xa69   :  { %1553 = vmax.xlane.f32.xlu0 %v1552_v58 }
 0xa76   :  { %1574 = vrot.lane.b32.xlu1 %v4633_v4, %s4435_s20 }
 0xa7a   :  { %1044 = vrot.lane.b32.xlu1 %v4723_v13, %s4436_s21 }
 0xa7e   :  { %1046 = vrot.lane.b32.xlu1 %v4721_v11, %s4436_s21 }
 0xa82   :  { %1388 = vrot.lane.b32.xlu1 %v1380_v47, %s4437_s22 }
 0xaf2   :  { %v1557_v59 = vpop.xlane.xlu1 %1556 }
 0xaf3   :  { %v1559_v60 = vsub.f32 %v1551_v51, %v1557_v59  ;;  %v1772_v51 = vld [vmem:[%s5087_s7 + $0x8] sm:$0xff] }
 0xaf4   :  { %v4231_v53 = vpack.c.bf16 %v1772_v51, %v1771_v50 }
 0xaf5   :  { %v1562_v61 = vmul.f32 1.442695, %v1559_v60 }
 0xaf6   :  { %v1575_v62 = vpop.permute.xlu1 %1574  ;;  %v1554_v63 = vpop.xlane.xlu0 %1553 }
 0xaf7   :  { %4323 = vpow2.f32 %v1562_v61  ;;  %v1558_v1 = vsub.f32 %v1550_v56, %v1554_v63  ;;  %4039 = vmatpush3.msra.mxu0 %v1575_v62 }
 0xaf8   :  { %4232 = vmatprep.subr.bf16.mxu0 %v4231_v53 }
 0xaf9   :  { %v1560_v2 = vmul.f32 1.442695, %v1558_v1 }
 0xafa   :  { %v1045_v20 = vpop.permute.xlu1 %1044 }
 0xafb   :  { %4325 = vpow2.f32 %v1560_v2  ;;  %v1050_v28 = vadd.f32 %v1045_v20, %v4633_v4 }
 0xafd   :  { %v1736_v36 = vsel %vm380_vm4, %v708_v33, %v1050_v28  ;;  %v1995_v33 = vld [vmem:[%s5092_s12 + $0x8] sm:$0xff] }
 0xafe   :  { %v1047_v21 = vpop.permute.xlu1 %1046 }
 0xaff   :  { %v1051_v23 = vadd.f32 %v1047_v21, %v4637_v5 }
 0xb01   :  { %v4324_v3 = vpop.eup %4323  ;;  %v1737_v29 = vsel %vm380_vm4, %v709_v25, %v1051_v23 }
 0xb02   :  { %v1567_v6 = vsel %vm380_vm4, %v4324_v3, 0.0  ;;  %v1389_v22 = vpop.permute.xlu1 %1388 }
 0xb03   :  { %1568 = vadd.xlane.f32.xlu0 %v1567_v6  ;;  %v1393_v24 = vadd.f32 %v1389_v22, %v4637_v5 }
 0xb05   :  { %v4326_v7 = vpop.eup %4325  ;;  %v1740_v32 = vsel %vm1738_vm5, %v1737_v29, %v1393_v24 }
 0xb06   :  { %v1564_v8 = vsel %vm380_vm4, %v4326_v7, 0.0 }
 0xb07   :  { %1565 = vadd.xlane.f32.xlu0 %v1564_v8 }
 0xb1d   :  { %1650 = vrot.lane.b32.xlu0 %v4637_v5, %s4435_s20 }
 0xb21   :  { %1386 = vrot.lane.b32.xlu0 %v1304_v49, %s4437_s22 }
 0xb90   :  { %v1569_v9 = vpop.xlane.xlu0 %1568 }
 0xb91   :  { %4327 = vrcp.f32 %v1569_v9 }
 0xb94   :  { %v1566_v10 = vpop.xlane.xlu0 %1565 }
 0xb95   :  { %4329 = vrcp.f32 %v1566_v10 }
 0xb98   :  { %v1651_v11 = vpop.permute.xlu0 %1650 }
 0xb99   :  { %4044 = vmatpush3.msra.mxu1 %v1651_v11 }
 0xb9b   :  { %v4328_v12 = vpop.eup %4327 }
 0xb9c   :  { %v1573_v13 = vmul.f32 %v4328_v12, %v4324_v3  ;;  %v1387_v26 = vpop.permute.xlu0 %1386  ;;  %v3749_v3 = vld [vmem:[%s5088_s8] ss:$0 sm:$0xff] }
 0xb9d   :  { %v1392_v31 = vadd.f32 %v1387_v26, %v4633_v4 }
 0xb9e   :  { %4046 = vmatmul.mubr.msk.f32.vlgmr.msra.gmra.mrb[16].mxu1 %vm380_vm4, %v1573_v13 }
 0xb9f   :  { %v4330_v14 = vpop.eup %4329  ;;  %4067 = vmatprep.mubr.msk.f32.mxu1 %vm4424_vm3, %v4423_v0  ;;  %v1739_v39 = vsel %vm1738_vm5, %v1736_v36, %v1392_v31  ;;  %v1997_v36 = vld [vmem:[%s5092_s12 + $0x18] sm:$0xff] }
 0xba0   :  { %v1571_v15 = vmul.f32 %v4330_v14, %v4326_v7 }
 0xba2   :  { %4041 = vmatmul.mubr.msk.f32.vlgmr.msra.gmra.mrb[18].mxu0 %vm380_vm4, %v1571_v15 }
 0xba3   :  { %4234 = vmatpush3.bf16.msra.mxu0 %v4231_v53 }
 0xba4   :  { %4236 = vmatprep.subr.bf16.mxu0 %v4235_v55 }
 0xba7   :  { %4238 = vmatpush3.bf16.msra.mxu0 %v4235_v55 }
 0xc71   :  { %v1722_v16 = vpop.f32.mrb[16].mxu1 }
 0xc72   :  { %1730 = vrot.lane.b32.xlu1 %v1722_v16, %s4438_s2  ;;  %v4047_v17 = vpop.f32.mrb[17].mxu1 }
 0xc75   :  { %v1646_v18 = vpop.f32.mrb[18].mxu0 }
 0xc76   :  { %1728 = vrot.lane.b32.xlu0 %v1646_v18, %s4438_s2  ;;  %v4042_v19 = vpop.f32.mrb[19].mxu0 }
 0xce4   :  { %v1731_v27 = vpop.permute.xlu1 %1730 }
 0xce5   :  { %v1735_v30 = vadd.f32 %v1731_v27, %v4637_v5 }
 0xce7   :  { %v1743_v34 = vsel %vm1741_vm6, %v1740_v32, %v1735_v30  ;;  %v1994_v32 = vld [vmem:[%s5092_s12] sm:$0xff] }
 0xce8   :  { %v1729_v40 = vpop.permute.xlu0 %1728  ;;  %v1747_v35 = vsel %vm295_vm2, %v1743_v34, 0.0 }
 0xce9   :  { %v1734_v37 = vadd.f32 %v1729_v40, %v4633_v4  ;;  %1748 = vadd.xlane.f32.xlu1 %v1747_v35  ;;  %v4245_v40 = vpack.c.bf16 %v1995_v33, %v1994_v32  ;;  %v4439_v35 = vmov 0.0|0.0  }
 0xcea   :  { %4239 = vmatprep.subr.bf16.mxu1 %v4439_v35 }
 0xceb   :  { %v1742_v5 = vsel %vm1741_vm6, %v1739_v39, %v1734_v37  ;;  %v1916_v37 = vld [vmem:[%s5090_s10] sm:$0xff]  ;;  %v1917_v39 = vld [vmem:[%s5090_s10 + $0x8] sm:$0xff]  ;;  %4246 = vmatprep.subr.bf16.mxu0 %v4245_v40 }
 0xcec   :  { %v1744_v41 = vsel %vm295_vm2, %v1742_v5, 0.0 }
 0xced   :  { %1745 = vadd.xlane.f32.xlu0 %v1744_v41  ;;  %v4240_v41 = vpack.c.bf16 %v1917_v39, %v1916_v37 }
 0xcef   :  { %4241 = vmatpush3.bf16.msra.mxu1 %v4240_v41 }
 0xcf0   :  { %4242 = vmatprep.subr.bf16.mxu1 %v4439_v35 }
 0xd76   :  { %v1749_v42 = vpop.xlane.xlu1 %1748 }
 0xd77   :  { %v1752_v43 = vmul.f32 0.03125, %v1749_v42  ;;  %v1918_v42 = vld [vmem:[%s5090_s10 + $0x10] sm:$0xff] }
 0xd79   :  { %v1754_v45 = vsub.f32 %v1743_v34, %v1752_v43  ;;  %v1996_v34 = vld [vmem:[%s5092_s12 + $0x10] sm:$0xff]  ;;  %v1919_v43 = vld [vmem:[%s5090_s10 + $0x18] sm:$0xff] }
 0xd7a   :  { %v1746_v38 = vpop.xlane.xlu0 %1745 }
 0xd7b   :  { %v1751_v44 = vmul.f32 0.03125, %v1746_v38  ;;  %v1756_v49 = vmul.f32 %v1754_v45, %v1754_v45  ;;  %v4243_v38 = vpack.c.bf16 %v1919_v43, %v1918_v42 }
 0xd7d   :  { %v1753_v46 = vsub.f32 %v1742_v5, %v1751_v44  ;;  %v1760_v4 = vsel %vm295_vm2, %v1756_v49, 0.0  ;;  %v4249_v5 = vpack.c.bf16 %v1997_v36, %v1996_v34  ;;  %4244 = vmatpush3.bf16.msra.mxu1 %v4243_v38  ;;  %v1915_v44 = vld [vmem:[%s5089_s9] sm:$0x1] }
 0xd7e   :  { %4081 = vmatprep.subr.mxu1 %v4423_v0 }
 0xd7f   :  { %v1755_v47 = vmul.f32 %v1753_v46, %v1753_v46 }
 0xd80   :  { %4068 = vmatmul.mubr.msk.f32.vlgmr.msra.gmra.mrb[18].mxu1 %vm295_vm2, %v1915_v44 }
 0xd81   :  { %v1757_v48 = vsel %vm295_vm2, %v1755_v47, 0.0  ;;  %4083 = vmatprep.mubr.msk.f32.mxu1 %vm4424_vm3, %v4423_v0 }
 0xd82   :  { %1758 = vadd.xlane.f32.xlu0 %v1757_v48 }
 0xd86   :  { %1761 = vadd.xlane.f32.xlu0 %v1760_v4 }
 0xe0f   :  { %v1759_v56 = vpop.xlane.xlu0 %1758 }
 0xe10   :  { %v1763_v57 = vmul.f32 0.03125, %v1759_v56 }
 0xe12   :  { %v1765_v58 = vadd.f32 1e-05, %v1763_v57 }
 0xe13   :  { %v1762_v59 = vpop.xlane.xlu0 %1761 }
 0xe14   :  { %4331 = vrsqrt.f32 %v1765_v58  ;;  %v1764_v60 = vmul.f32 0.03125, %v1762_v59 }
 0xe16   :  { %v1766_v61 = vadd.f32 1e-05, %v1764_v60 }
 0xe18   :  { %4333 = vrsqrt.f32 %v1766_v61 }
 0xe1e   :  { %v4332_v62 = vpop.eup %4331 }
 0xe1f   :  { %v1769_v63 = vmul.f32 %v4332_v62, %v1753_v46 }
 0xe21   :  { %4056 = vmatprep.mubr.msk.f32.mxu0 %vm295_vm2, %v1769_v63 }
 0xe22   :  { %v4334_v1 = vpop.eup %4333 }
 0xe23   :  { %v1770_v2 = vmul.f32 %v4334_v1, %v1754_v45  ;;  %v3757_v1 = vld [vmem:[%s5093_s13] ss:$0 sm:$0xff] }
 0xe25   :  { %4057 = vmatmul.mubr.msk.f32.vlgmr.msra.gmra.mrb[20].mxu0 %vm295_vm2, %v1770_v2 }
 0xe26   :  { %4248 = vmatpush3.bf16.msra.mxu0 %v4245_v40 }
 0xe27   :  { %4250 = vmatprep.subr.bf16.mxu0 %v4249_v5 }
 0xe2a   :  { %4252 = vmatpush3.bf16.msra.mxu0 %v4249_v5 }
 0xe2b   :  { %4091 = vmatprep.subr.mxu0 %v4423_v0 }
 0xe53   :  { %v1990_v62 = vpop.f32.mrb[18].mxu1 }
 0xef8   :  { %v4058_v6 = vpop.f32.mrb[20].mxu0 }
 0xef9   :  { %v1860_v7 = vadd.f32 %v4058_v6, %v3749_v3  ;;  %v1854_v8 = vpop.f32.mrb[21].mxu0 }
 0xefa   :  { %v1855_v9 = vadd.f32 %v3749_v3, %v1854_v8  ;;  %v1920_v3 = vld [vmem:[%s5091_s11] sm:$0x1] }
 0xefb   :  { %v3753_v10 = vmul.f32 -1.442695, %v1860_v7  ;;  %v4862_v8 = vadd.f32 %v1990_v62, %v1920_v3 }
 0xefc   :  { %v3752_v11 = vmul.f32 -1.442695, %v1855_v9 }
 0xefd   :  { %4335 = vpow2.f32 %v3753_v10 }
 0xefe   :  { %4337 = vpow2.f32 %v3752_v11 }
 0xf07   :  { %v4336_v12 = vpop.eup %4335 }
 0xf08   :  { %v4338_v13 = vpop.eup %4337  ;;  %v1870_v14 = vadd.f32 1.0, %v4336_v12 }
 0xf09   :  { %v1869_v15 = vadd.f32 1.0, %v4338_v13 }
 0xf0a   :  { %4339 = vrcp.f32 %v1870_v14 }
 0xf0b   :  { %4341 = vrcp.f32 %v1869_v15 }
 0xf14   :  { %v4340_v16 = vpop.eup %4339 }
 0xf15   :  { %v4342_v17 = vpop.eup %4341  ;;  %v1876_v18 = vadd.f32 %v4340_v16, %v1770_v2 }
 0xf16   :  { %v1875_v19 = vadd.f32 %v4342_v17, %v1769_v63  ;;  %v4069_v63 = vpop.f32.mrb[19].mxu1 }
 0xf17   :  { %v1880_v20 = vsel %vm295_vm2, %v1876_v18, 0.0 }
 0xf18   :  { %1881 = vadd.xlane.f32.xlu0 %v1880_v20  ;;  %v1877_v21 = vsel %vm295_vm2, %v1875_v19, 0.0 }
 0xf19   :  { %1878 = vadd.xlane.f32.xlu1 %v1877_v21 }
 0xfa5   :  { %v1882_v22 = vpop.xlane.xlu0 %1881 }
 0xfa6   :  { %v1884_v23 = vmul.f32 0.03125, %v1882_v22  ;;  %v1879_v24 = vpop.xlane.xlu1 %1878 }
 0xfa7   :  { %v1883_v25 = vmul.f32 0.03125, %v1879_v24 }
 0xfa8   :  { %v1886_v26 = vsub.f32 %v1876_v18, %v1884_v23 }
 0xfa9   :  { %v1885_v27 = vsub.f32 %v1875_v19, %v1883_v25 }
 0xfaa   :  { %v1888_v28 = vmul.f32 %v1886_v26, %v1886_v26 }
 0xfab   :  { %v1887_v29 = vmul.f32 %v1885_v27, %v1885_v27 }
 0xfac   :  { %v1892_v30 = vsel %vm295_vm2, %v1888_v28, 0.0 }
 0xfad   :  { %1893 = vadd.xlane.f32.xlu0 %v1892_v30  ;;  %v1889_v31 = vsel %vm295_vm2, %v1887_v29, 0.0 }
 0xfae   :  { %1890 = vadd.xlane.f32.xlu1 %v1889_v31 }
0x103a   :  { %v1894_v45 = vpop.xlane.xlu0 %1893 }
0x103b   :  { %v1896_v46 = vmul.f32 0.03125, %v1894_v45  ;;  %v1891_v47 = vpop.xlane.xlu1 %1890 }
0x103c   :  { %v1895_v48 = vmul.f32 0.03125, %v1891_v47 }
0x103d   :  { %v1898_v49 = vadd.f32 1e-05, %v1896_v46 }
0x103e   :  { %v1897_v4 = vadd.f32 1e-05, %v1895_v48 }
0x103f   :  { %4343 = vrsqrt.f32 %v1898_v49 }
0x1040   :  { %4345 = vrsqrt.f32 %v1897_v4 }
0x1049   :  { %v4344_v50 = vpop.eup %4343 }
0x104a   :  { %v4346_v51 = vpop.eup %4345  ;;  %v1902_v52 = vmul.f32 %v4344_v50, %v1886_v26 }
0x104b   :  { %v1901_v53 = vmul.f32 %v4346_v51, %v1885_v27 }
0x104c   :  { %v3755_v54 = vmul.f32 -1.442695, %v1902_v52 }
0x104d   :  { %v3754_v55 = vmul.f32 -1.442695, %v1901_v53 }
0x104e   :  { %4347 = vpow2.f32 %v3755_v54 }
0x104f   :  { %4349 = vpow2.f32 %v3754_v55 }
0x1058   :  { %v4348_v56 = vpop.eup %4347 }
0x1059   :  { %v4350_v57 = vpop.eup %4349  ;;  %v1910_v58 = vadd.f32 1.0, %v4348_v56 }
0x105a   :  { %v1909_v59 = vadd.f32 1.0, %v4350_v57 }
0x105c   :  { %4351 = vrcp.f32 %v1909_v59 }
0x105d   :  { %4353 = vrcp.f32 %v1910_v58 }
0x1066   :  { %v4352_v60 = vpop.eup %4351 }
0x1067   :  { %v4354_v61 = vpop.eup %4353  ;;  %4078 = vmatprep.mubr.msk.f32.mxu0 %vm295_vm2, %v4352_v60 }
0x1068   :  { %4079 = vmatmul.mubr.msk.f32.vlgmr.msra.gmra.mrb[22].mxu0 %vm295_vm2, %v4354_v61 }
0x1069   :  { %4093 = vmatprep.mubr.msk.f32.mxu0 %vm4424_vm3, %v4423_v0 }
0x113b   :  { %v4080_v2 = vpop.f32.mrb[22].mxu0 }
0x113c   :  { %v2077_v6 = vpop.f32.mrb[23].mxu0  ;;  %v4867_v9 = vadd.f32 %v4080_v2, %v3757_v1 }
0x113d   :  { %v4860_v7 = vadd.f32 %v3757_v1, %v2077_v6 }
0x113f   :  { %4082 = vmatpush3.xpose.msk.msra.mxu1 %vm380_vm4, %v4860_v7 }
0x1140   :  { %4086 = vmatprep.subr.mxu1 %v4423_v0 }
0x1142   :  { %4084 = vmatmul.mubr.msk.f32.vlgmr.msra.gmra.mrb[20].mxu1 %vm380_vm4, %v4862_v8 }
0x1143   :  { %4087 = vmatpush3.xpose.msk.msra.mxu1 %vm380_vm4, %v4867_v9  ;;  %4088 = vmatprep.mubr.msk.f32.mxu1 %vm4424_vm3, %v4423_v0 }
0x1144   :  { %4096 = vmatprep.subr.mxu1 %v4423_v0 }
0x1146   :  { %4089 = vmatmul.mubr.msk.f32.vlgmr.msra.gmra.mrb[22].mxu1 %vm380_vm4, %v4862_v8 }
0x1147   :  { %4098 = vmatprep.mubr.msk.f32.mxu1 %vm4424_vm3, %v4423_v0 }
0x1215   :  { %v2158_v10 = vpop.f32.mrb[20].mxu1 }
0x1216   :  { %v2235_v11 = vmul.f32 0.17677669, %v2158_v10  ;;  %v4085_v12 = vpop.f32.mrb[21].mxu1 }
0x1218   :  { %v2238_v13 = vsel %vm2237_vm7, %v2235_v11, -inf }
0x1219   :  { %2239 = vmax.xlane.f32.xlu0 %v2238_v13  ;;  %v2231_v14 = vpop.f32.mrb[22].mxu1 }
0x121a   :  { %v2236_v15 = vmul.f32 0.17677669, %v2231_v14  ;;  %v4090_v16 = vpop.f32.mrb[23].mxu1 }
0x121c   :  { %v2241_v17 = vsel %vm2237_vm7, %v2236_v15, -inf }
0x121d   :  { %2242 = vmax.xlane.f32.xlu1 %v2241_v17 }
0x122e   :  { %2336 = vrot.lane.b32.xlu1 %v4867_v9, %s4425_s25 }
0x122f   :  { %2260 = vrot.lane.b32.xlu0 %v4860_v7, %s4425_s25 }
0x1232   :  { %2492 = vrot.lane.b32.xlu1 %v4867_v9, %s4428_s27 }
0x12a6   :  { %v2240_v18 = vpop.xlane.xlu0 %2239 }
0x12a7   :  { %v2244_v19 = vsub.f32 %v2235_v11, %v2240_v18 }
0x12a9   :  { %v2246_v20 = vmul.f32 1.442695, %v2244_v19 }
0x12aa   :  { %v2261_v21 = vpop.permute.xlu0 %2260  ;;  %v2243_v22 = vpop.xlane.xlu1 %2242 }
0x12ab   :  { %4355 = vpow2.f32 %v2246_v20  ;;  %v2245_v23 = vsub.f32 %v2236_v15, %v2243_v22  ;;  %4092 = vmatpush3.msra.mxu0 %v2261_v21 }
0x12ac   :  { %4101 = vmatprep.subr.mxu0 %v4423_v0 }
0x12ad   :  { %v2248_v24 = vmul.f32 1.442695, %v2245_v23 }
0x12ae   :  { %v2337_v25 = vpop.permute.xlu1 %2336 }
0x12af   :  { %4357 = vpow2.f32 %v2248_v24  ;;  %4097 = vmatpush3.msra.mxu1 %v2337_v25 }
0x12b0   :  { %4106 = vmatprep.subr.mxu1 %v4423_v0 }
0x12b2   :  { %v2493_v30 = vpop.permute.xlu1 %2492 }
0x12b5   :  { %v4356_v26 = vpop.eup %4355 }
0x12b6   :  { %v2250_v27 = vsel %vm2237_vm7, %v4356_v26, 0.0 }
0x12b7   :  { %2251 = vadd.xlane.f32.xlu0 %v2250_v27 }
0x12b9   :  { %v4358_v28 = vpop.eup %4357 }
0x12ba   :  { %v2253_v29 = vsel %vm2237_vm7, %v4358_v28, 0.0 }
0x12bb   :  { %2254 = vadd.xlane.f32.xlu1 %v2253_v29 }
0x12cc   :  { %2416 = vrot.lane.b32.xlu1 %v4860_v7, %s4428_s27 }
0x12cd   :  { %2414 = vrot.lane.b32.xlu0 %v4862_v8, %s4428_s27 }
0x1344   :  { %v2252_v31 = vpop.xlane.xlu0 %2251 }
0x1345   :  { %4359 = vrcp.f32 %v2252_v31 }
0x1348   :  { %v2255_v32 = vpop.xlane.xlu1 %2254  ;;  %v2415_v39 = vpop.permute.xlu0 %2414 }
0x1349   :  { %4361 = vrcp.f32 %v2255_v32 }
0x134c   :  { %v2417_v40 = vpop.permute.xlu1 %2416 }
0x134f   :  { %v4360_v33 = vpop.eup %4359 }
0x1350   :  { %v2257_v34 = vmul.f32 %v4360_v33, %v4356_v26 }
0x1352   :  { %4094 = vmatmul.mubr.msk.f32.vlgmr.msra.gmra.mrb[24].mxu0 %vm380_vm4, %v2257_v34 }
0x1353   :  { %v4362_v36 = vpop.eup %4361  ;;  %4102 = vmatpush3.xpose.msk.msra.mxu0 %vm380_vm4, %v2417_v40  ;;  %4103 = vmatprep.mubr.msk.f32.mxu0 %vm4424_vm3, %v4423_v0 }
0x1354   :  { %v2259_v37 = vmul.f32 %v4362_v36, %v4358_v28  ;;  %4111 = vmatprep.subr.mxu0 %v4423_v0 }
0x1356   :  { %4099 = vmatmul.mubr.msk.f32.vlgmr.msra.gmra.mrb[24].mxu1 %vm380_vm4, %v2259_v37  ;;  %4104 = vmatmul.mubr.msk.f32.vlgmr.msra.gmra.mrb[26].mxu0 %vm380_vm4, %v2415_v39 }
0x1357   :  { %4107 = vmatpush3.xpose.msk.msra.mxu1 %vm380_vm4, %v2493_v30  ;;  %4108 = vmatprep.mubr.msk.f32.mxu1 %vm4424_vm3, %v4423_v0 }
0x1358   :  { %4116 = vmatprep.subr.mxu1 %v4423_v0  ;;  %4113 = vmatprep.mubr.msk.f32.mxu0 %vm4424_vm3, %v4423_v0 }
0x135a   :  { %4109 = vmatmul.mubr.msk.f32.vlgmr.msra.gmra.mrb[26].mxu1 %vm380_vm4, %v2415_v39 }
0x135b   :  { %4118 = vmatprep.mubr.msk.f32.mxu1 %vm4424_vm3, %v4423_v0 }
0x1425   :  { %v4912_v5 = vpop.f32.mrb[24].mxu0 }
0x1426   :  { %v4095_v41 = vpop.f32.mrb[25].mxu0 }
0x1429   :  { %v4914_v42 = vpop.f32.mrb[24].mxu1  ;;  %v2488_v43 = vpop.f32.mrb[26].mxu0 }
0x142a   :  { %v2566_v38 = vmul.f32 0.17677669, %v2488_v43  ;;  %v4100_v44 = vpop.f32.mrb[25].mxu1  ;;  %v4105_v45 = vpop.f32.mrb[27].mxu0 }
0x142c   :  { %v2568_v46 = vsel %vm2237_vm7, %v2566_v38, -inf }
0x142d   :  { %2569 = vmax.xlane.f32.xlu0 %v2568_v46  ;;  %v2562_v47 = vpop.f32.mrb[26].mxu1 }
0x142e   :  { %v2567_v48 = vmul.f32 0.17677669, %v2562_v47  ;;  %v4110_v49 = vpop.f32.mrb[27].mxu1 }
0x1430   :  { %v2571_v4 = vsel %vm2237_vm7, %v2567_v48, -inf }
0x1431   :  { %2572 = vmax.xlane.f32.xlu1 %v2571_v4 }
0x1442   :  { %2590 = vrot.lane.b32.xlu1 %v4860_v7, %s4427_s26 }
0x1443   :  { %2666 = vrot.lane.b32.xlu0 %v4867_v9, %s4427_s26 }
0x1446   :  { %2830 = vrot.lane.b32.xlu1 %v4867_v9, %s4431_s0 }
0x14ba   :  { %v2570_v50 = vpop.xlane.xlu0 %2569 }
0x14bb   :  { %v2574_v51 = vsub.f32 %v2566_v38, %v2570_v50 }
0x14bd   :  { %v2576_v52 = vmul.f32 1.442695, %v2574_v51 }
0x14be   :  { %v2667_v53 = vpop.permute.xlu0 %2666  ;;  %v2573_v54 = vpop.xlane.xlu1 %2572 }
0x14bf   :  { %4363 = vpow2.f32 %v2576_v52  ;;  %v2575_v55 = vsub.f32 %v2567_v48, %v2573_v54  ;;  %4117 = vmatpush3.msra.mxu1 %v2667_v53 }
0x14c0   :  { %4126 = vmatprep.subr.mxu1 %v4423_v0 }
0x14c1   :  { %v2578_v56 = vmul.f32 1.442695, %v2575_v55 }
0x14c2   :  { %v2591_v57 = vpop.permute.xlu1 %2590 }
0x14c3   :  { %4365 = vpow2.f32 %v2578_v56  ;;  %4112 = vmatpush3.msra.mxu0 %v2591_v57 }
0x14c4   :  { %4121 = vmatprep.subr.mxu0 %v4423_v0 }
0x14c6   :  { %v2831_v62 = vpop.permute.xlu1 %2830 }
0x14c9   :  { %v4364_v58 = vpop.eup %4363 }
0x14ca   :  { %v2580_v59 = vsel %vm2237_vm7, %v4364_v58, 0.0 }
0x14cb   :  { %2581 = vadd.xlane.f32.xlu1 %v2580_v59 }
0x14cd   :  { %v4366_v60 = vpop.eup %4365 }
0x14ce   :  { %v2583_v61 = vsel %vm2237_vm7, %v4366_v60, 0.0 }
0x14cf   :  { %2584 = vadd.xlane.f32.xlu0 %v2583_v61 }
0x14dc   :  { %2752 = vrot.lane.b32.xlu1 %v4862_v8, %s4431_s0 }
0x14e5   :  { %2754 = vrot.lane.b32.xlu0 %v4860_v7, %s4431_s0 }
0x1558   :  { %v2582_v63 = vpop.xlane.xlu1 %2581 }
0x1559   :  { %4367 = vrcp.f32 %v2582_v63 }
0x155c   :  { %v2585_v1 = vpop.xlane.xlu0 %2584  ;;  %v2753_v12 = vpop.permute.xlu1 %2752 }
0x155d   :  { %4369 = vrcp.f32 %v2585_v1 }
0x1560   :  { %v2755_v6 = vpop.permute.xlu0 %2754 }
0x1563   :  { %v4368_v2 = vpop.eup %4367 }
0x1564   :  { %v2587_v3 = vmul.f32 %v4368_v2, %v4364_v58 }
0x1566   :  { %4114 = vmatmul.mubr.msk.f32.vlgmr.msra.gmra.mrb[28].mxu0 %vm380_vm4, %v2587_v3 }
0x1567   :  { %v4370_v10 = vpop.eup %4369  ;;  %4122 = vmatpush3.xpose.msk.msra.mxu0 %vm380_vm4, %v2755_v6  ;;  %4123 = vmatprep.mubr.msk.f32.mxu0 %vm4424_vm3, %v4423_v0 }
0x1568   :  { %v2589_v11 = vmul.f32 %v4370_v10, %v4366_v60  ;;  %4131 = vmatprep.subr.mxu0 %v4423_v0 }
0x156a   :  { %4119 = vmatmul.mubr.msk.f32.vlgmr.msra.gmra.mrb[28].mxu1 %vm380_vm4, %v2589_v11  ;;  %4124 = vmatmul.mubr.msk.f32.vlgmr.msra.gmra.mrb[30].mxu0 %vm380_vm4, %v2753_v12 }
0x156b   :  { %4127 = vmatpush3.xpose.msk.msra.mxu1 %vm380_vm4, %v2831_v62  ;;  %4128 = vmatprep.mubr.msk.f32.mxu1 %vm4424_vm3, %v4423_v0 }
0x156c   :  { %4136 = vmatprep.subr.mxu1 %v4423_v0  ;;  %4133 = vmatprep.mubr.msk.f32.mxu0 %vm4424_vm3, %v4423_v0 }
0x156e   :  { %4129 = vmatmul.mubr.msk.f32.vlgmr.msra.gmra.mrb[30].mxu1 %vm380_vm4, %v2753_v12 }
0x156f   :  { %4138 = vmatprep.mubr.msk.f32.mxu1 %vm4424_vm3, %v4423_v0 }
0x1639   :  { %v4948_v13 = vpop.f32.mrb[28].mxu0 }
0x163a   :  { %v4115_v14 = vpop.f32.mrb[29].mxu0 }
0x163d   :  { %v4950_v15 = vpop.f32.mrb[28].mxu1  ;;  %v2826_v16 = vpop.f32.mrb[30].mxu0 }
0x163e   :  { %v2904_v17 = vmul.f32 0.17677669, %v2826_v16  ;;  %v4120_v18 = vpop.f32.mrb[29].mxu1  ;;  %v4125_v19 = vpop.f32.mrb[31].mxu0 }
0x1640   :  { %v2906_v20 = vsel %vm2237_vm7, %v2904_v17, -inf }
0x1641   :  { %2907 = vmax.xlane.f32.xlu1 %v2906_v20  ;;  %v2900_v21 = vpop.f32.mrb[30].mxu1 }
0x1642   :  { %v2905_v22 = vmul.f32 0.17677669, %v2900_v21  ;;  %v4130_v23 = vpop.f32.mrb[31].mxu1 }
0x1644   :  { %v2909_v24 = vsel %vm2237_vm7, %v2905_v22, -inf }
0x1645   :  { %2910 = vmax.xlane.f32.xlu0 %v2909_v24 }
0x1652   :  { %3004 = vrot.lane.b32.xlu1 %v4867_v9, %s4430_s30 }
0x1656   :  { %3168 = vrot.lane.b32.xlu1 %v4867_v9, %s4434_s1 }
0x165a   :  { %3092 = vrot.lane.b32.xlu1 %v4860_v7, %s4434_s1 }
0x165b   :  { %2928 = vrot.lane.b32.xlu0 %v4860_v7, %s4430_s30 }
0x16ce   :  { %v2908_v25 = vpop.xlane.xlu1 %2907 }
0x16cf   :  { %v2912_v26 = vsub.f32 %v2904_v17, %v2908_v25 }
0x16d1   :  { %v2914_v27 = vmul.f32 1.442695, %v2912_v26  ;;  %v2413_v26 = vadd.f32 %v4914_v42, %v4862_v8 }
0x16d2   :  { %v3005_v28 = vpop.permute.xlu1 %3004  ;;  %v2911_v29 = vpop.xlane.xlu0 %2910 }
0x16d3   :  { %4371 = vpow2.f32 %v2914_v27  ;;  %v2913_v30 = vsub.f32 %v2905_v22, %v2911_v29  ;;  %4137 = vmatpush3.msra.mxu1 %v3005_v28 }
0x16d4   :  { %4146 = vmatprep.subr.mxu1 %v4423_v0 }
0x16d5   :  { %v2916_v31 = vmul.f32 1.442695, %v2913_v30 }
0x16d6   :  { %v2929_v32 = vpop.permute.xlu0 %2928  ;;  %v3169_v41 = vpop.permute.xlu1 %3168 }
0x16d7   :  { %4373 = vpow2.f32 %v2916_v31  ;;  %4132 = vmatpush3.msra.mxu0 %v2929_v32 }
0x16d8   :  { %4141 = vmatprep.subr.mxu0 %v4423_v0 }
0x16da   :  { %v3093_v44 = vpop.permute.xlu1 %3092 }
0x16dd   :  { %v4372_v33 = vpop.eup %4371 }
0x16de   :  { %v2918_v34 = vsel %vm2237_vm7, %v4372_v33, 0.0 }
0x16df   :  { %2919 = vadd.xlane.f32.xlu0 %v2918_v34 }
0x16e1   :  { %v4374_v40 = vpop.eup %4373 }
0x16e2   :  { %v2921_v36 = vsel %vm2237_vm7, %v4374_v40, 0.0 }
0x16e3   :  { %2922 = vadd.xlane.f32.xlu0 %v2921_v36 }
0x16f9   :  { %3090 = vrot.lane.b32.xlu0 %v4862_v8, %s4434_s1 }
0x176c   :  { %v2920_v37 = vpop.xlane.xlu0 %2919 }
0x176d   :  { %4375 = vrcp.f32 %v2920_v37 }
0x1770   :  { %v2923_v39 = vpop.xlane.xlu0 %2922 }
0x1771   :  { %4377 = vrcp.f32 %v2923_v39 }
0x1774   :  { %v3091_v47 = vpop.permute.xlu0 %3090 }
0x1777   :  { %v4376_v43 = vpop.eup %4375 }
0x1778   :  { %v2925_v38 = vmul.f32 %v4376_v43, %v4372_v33  ;;  %v2412_v33 = vadd.f32 %v4912_v5, %v4862_v8 }
0x177a   :  { %4134 = vmatmul.mubr.msk.f32.vlgmr.msra.gmra.mrb[32].mxu0 %vm380_vm4, %v2925_v38 }
0x177b   :  { %v4378_v45 = vpop.eup %4377  ;;  %4142 = vmatpush3.xpose.msk.msra.mxu0 %vm380_vm4, %v3093_v44  ;;  %4143 = vmatprep.mubr.msk.f32.mxu0 %vm4424_vm3, %v4423_v0 }
0x177c   :  { %v2927_v46 = vmul.f32 %v4378_v45, %v4374_v40  ;;  %4151 = vmatprep.subr.mxu0 %v4423_v0 }
0x177e   :  { %4139 = vmatmul.mubr.msk.f32.vlgmr.msra.gmra.mrb[32].mxu1 %vm380_vm4, %v2927_v46  ;;  %4144 = vmatmul.mubr.msk.f32.vlgmr.msra.gmra.mrb[34].mxu0 %vm380_vm4, %v3091_v47 }
0x177f   :  { %4147 = vmatpush3.xpose.msk.msra.mxu1 %vm380_vm4, %v3169_v41  ;;  %4148 = vmatprep.mubr.msk.f32.mxu1 %vm4424_vm3, %v4423_v0 }
0x1780   :  { %4156 = vmatprep.subr.mxu1 %v4423_v0  ;;  %4153 = vmatprep.mubr.msk.f32.mxu0 %vm4424_vm3, %v4423_v0 }
0x1782   :  { %4149 = vmatmul.mubr.msk.f32.vlgmr.msra.gmra.mrb[34].mxu1 %vm380_vm4, %v3091_v47 }
0x1783   :  { %4158 = vmatprep.mubr.msk.f32.mxu1 %vm4424_vm3, %v4423_v0 }
0x184d   :  { %v3000_v48 = vpop.f32.mrb[32].mxu0 }
0x184e   :  { %v4135_v49 = vpop.f32.mrb[33].mxu0 }
0x1851   :  { %v3076_v4 = vpop.f32.mrb[32].mxu1  ;;  %v3164_v50 = vpop.f32.mrb[34].mxu0 }
0x1852   :  { %v3242_v51 = vmul.f32 0.17677669, %v3164_v50  ;;  %v4140_v52 = vpop.f32.mrb[33].mxu1  ;;  %v4145_v53 = vpop.f32.mrb[35].mxu0 }
0x1853   :  { %v3471_v52 = vld [vmem:[%s5094_s14 + $0x8] sm:$0xff] }
0x1854   :  { %v3244_v54 = vsel %vm2237_vm7, %v3242_v51, -inf }
0x1855   :  { %3245 = vmax.xlane.f32.xlu0 %v3244_v54  ;;  %v3238_v55 = vpop.f32.mrb[34].mxu1  ;;  %v3472_v54 = vld [vmem:[%s5094_s14 + $0x10] sm:$0xff] }
0x1856   :  { %v3243_v56 = vmul.f32 0.17677669, %v3238_v55  ;;  %v4150_v57 = vpop.f32.mrb[35].mxu1  ;;  %v3473_v55 = vld [vmem:[%s5094_s14 + $0x18] sm:$0xff] }
0x1858   :  { %v3247_v58 = vsel %vm2237_vm7, %v3243_v56, -inf }
0x1859   :  { %3248 = vmax.xlane.f32.xlu1 %v3247_v58 }
0x18e2   :  { %v3246_v59 = vpop.xlane.xlu0 %3245 }
0x18e3   :  { %v3250_v60 = vsub.f32 %v3242_v51, %v3246_v59  ;;  %v3470_v51 = vld [vmem:[%s5094_s14] sm:$0xff] }
0x18e4   :  { %v4254_v53 = vpack.c.bf16 %v3471_v52, %v3470_v51 }
0x18e5   :  { %v3252_v61 = vmul.f32 1.442695, %v3250_v60 }
0x18e6   :  { %v3249_v62 = vpop.xlane.xlu1 %3248 }
0x18e7   :  { %4379 = vpow2.f32 %v3252_v61  ;;  %v3251_v63 = vsub.f32 %v3243_v56, %v3249_v62  ;;  %v4257_v56 = vpack.c.bf16 %v3473_v55, %v3472_v54 }
0x18e9   :  { %v3254_v1 = vmul.f32 1.442695, %v3251_v63 }
0x18eb   :  { %4381 = vpow2.f32 %v3254_v1 }
0x18f1   :  { %v4380_v2 = vpop.eup %4379 }
0x18f2   :  { %v3256_v3 = vsel %vm2237_vm7, %v4380_v2, 0.0 }
0x18f3   :  { %3257 = vadd.xlane.f32.xlu1 %v3256_v3  ;;  %v3784_v3 = vld [vmem:[%s5095_s15] ss:$0 sm:$0xff] }
0x18f5   :  { %v4382_v6 = vpop.eup %4381 }
0x18f6   :  { %v3259_v10 = vsel %vm2237_vm7, %v4382_v6, 0.0 }
0x18f7   :  { %3260 = vadd.xlane.f32.xlu0 %v3259_v10 }
0x1904   :  { %3266 = vrot.lane.b32.xlu1 %v4860_v7, %s4433_s19 }
0x1908   :  { %2746 = vrot.lane.b32.xlu1 %v4950_v15, %s4436_s21 }
0x190c   :  { %2744 = vrot.lane.b32.xlu1 %v4948_v13, %s4436_s21 }
0x190d   :  { %3342 = vrot.lane.b32.xlu0 %v4867_v9, %s4433_s19 }
0x1910   :  { %3082 = vrot.lane.b32.xlu1 %v3000_v48, %s4437_s22 }
0x1911   :  { %3084 = vrot.lane.b32.xlu0 %v3076_v4, %s4437_s22 }
0x1980   :  { %v3258_v11 = vpop.xlane.xlu1 %3257 }
0x1981   :  { %4383 = vrcp.f32 %v3258_v11 }
0x1984   :  { %v3261_v12 = vpop.xlane.xlu0 %3260  ;;  %v3267_v14 = vpop.permute.xlu1 %3266 }
0x1985   :  { %4385 = vrcp.f32 %v3261_v12  ;;  %4152 = vmatpush3.msra.mxu0 %v3267_v14 }
0x1986   :  { %4253 = vmatprep.subr.bf16.mxu0 %v4439_v35 }
0x1988   :  { %v3343_v7 = vpop.permute.xlu0 %3342  ;;  %v2747_v21 = vpop.permute.xlu1 %2746 }
0x1989   :  { %4157 = vmatpush3.msra.mxu1 %v3343_v7  ;;  %v2751_v24 = vadd.f32 %v2747_v21, %v4862_v8 }
0x198a   :  { %4259 = vmatprep.subr.bf16.mxu1 %v4439_v35 }
0x198b   :  { %v4384_v13 = vpop.eup %4383  ;;  %v3429_v28 = vsel %vm380_vm4, %v2413_v26, %v2751_v24 }
0x198c   :  { %v3263_v15 = vmul.f32 %v4384_v13, %v4380_v2  ;;  %v2745_v22 = vpop.permute.xlu1 %2744  ;;  %v3085_v23 = vpop.permute.xlu0 %3084 }
0x198d   :  { %v3089_v25 = vadd.f32 %v3085_v23, %v4862_v8  ;;  %v2750_v29 = vadd.f32 %v2745_v22, %v4862_v8 }
0x198e   :  { %4154 = vmatmul.mubr.msk.f32.vlgmr.msra.gmra.mrb[36].mxu0 %vm380_vm4, %v3263_v15 }
0x198f   :  { %v4386_v9 = vpop.eup %4385  ;;  %4169 = vmatprep.mubr.msk.f32.mxu0 %vm4424_vm3, %v4423_v0  ;;  %v3431_v31 = vsel %vm1738_vm5, %v3429_v28, %v3089_v25  ;;  %v3428_v42 = vsel %vm380_vm4, %v2412_v33, %v2750_v29  ;;  %4255 = vmatpush3.bf16.msra.mxu0 %v4254_v53  ;;  %v3603_v29 = vld [vmem:[%s5096_s16] sm:$0xff]  ;;  %v3606_v33 = vld [vmem:[%s5096_s16 + $0x18] sm:$0xff] }
0x1990   :  { %v3265_v16 = vmul.f32 %v4386_v9, %v4382_v6  ;;  %v3083_v27 = vpop.permute.xlu1 %3082  ;;  %4256 = vmatprep.subr.bf16.mxu0 %v4439_v35 }
0x1991   :  { %v3088_v32 = vadd.f32 %v3083_v27, %v4862_v8 }
0x1992   :  { %4159 = vmatmul.mubr.msk.f32.vlgmr.msra.gmra.mrb[36].mxu1 %vm380_vm4, %v3265_v16 }
0x1993   :  { %4180 = vmatprep.mubr.msk.f32.mxu1 %vm4424_vm3, %v4423_v0  ;;  %v3430_v37 = vsel %vm1738_vm5, %v3428_v42, %v3088_v32  ;;  %4258 = vmatpush3.bf16.msra.mxu0 %v4257_v56  ;;  %v3605_v32 = vld [vmem:[%s5096_s16 + $0x10] sm:$0xff] }
0x1a61   :  { %v3338_v17 = vpop.f32.mrb[36].mxu0 }
0x1a62   :  { %v4155_v18 = vpop.f32.mrb[37].mxu0 }
0x1a65   :  { %v3414_v19 = vpop.f32.mrb[36].mxu1 }
0x1a66   :  { %3422 = vrot.lane.b32.xlu0 %v3414_v19, %s4438_s2  ;;  %v4160_v20 = vpop.f32.mrb[37].mxu1 }
0x1a6a   :  { %3420 = vrot.lane.b32.xlu0 %v3338_v17, %s4438_s2 }
0x1ad8   :  { %v3423_v0 = vpop.permute.xlu0 %3422 }
0x1ad9   :  { %v3427_v30 = vadd.f32 %v3423_v0, %v4862_v8 }
0x1adb   :  { %v3433_v34 = vsel %vm1741_vm6, %v3431_v31, %v3427_v30  ;;  %v3604_v30 = vld [vmem:[%s5096_s16 + $0x8] sm:$0xff] }
0x1adc   :  { %v3421_v40 = vpop.permute.xlu0 %3420  ;;  %v3436_v39 = vrot.slane %v3433_v34, 7  ;;  %v4260_v31 = vpack.c.bf16 %v3604_v30, %v3603_v29 }
0x1add   :  { %v3426_v36 = vadd.f32 %v3421_v40, %v4862_v8 }
0x1ade   :  { %4261 = vmatpush3.bf16.msra.mxu1 %v4260_v31 }
0x1adf   :  { %v3432_v41 = vsel %vm1741_vm6, %v3430_v37, %v3426_v36  ;;  %4262 = vmatprep.subr.bf16.mxu1 %v4439_v35 }
0x1ae0   :  { %v3438_v43 = vsel %vm3437_vm8, %v3436_v39, %v3432_v41 }
0x1ae1   :  { %v3441_v38 = vsel %vm3440_vm9, %v3438_v43, 0.0 }
0x1ae2   :  { %3442 = vadd.xlane.f32.xlu1 %v3441_v38 }
0x1b6f   :  { %v3443_v5 = vpop.xlane.xlu1 %3442 }
0x1b70   :  { %v3444_v44 = vmul.f32 0.03125, %v3443_v5 }
0x1b72   :  { %v3446_v45 = vrot.slane %v3444_v44, 1  ;;  %v3449_v46 = vsub.f32 %v3432_v41, %v3444_v44  ;;  %v3787_v44 = vld [vmem:[%s5097_s17] ss:$0 sm:$0xff] }
0x1b74   :  { %v3450_v47 = vsub.f32 %v3433_v34, %v3446_v45  ;;  %v3451_v49 = vmul.f32 %v3449_v46, %v3449_v46  ;;  %v4263_v34 = vpack.c.bf16 %v3606_v33, %v3605_v32 }
0x1b76   :  { %v3452_v48 = vmul.f32 %v3450_v47, %v3450_v47  ;;  %4264 = vmatpush3.bf16.msra.mxu1 %v4263_v34 }
0x1b78   :  { %v3455_v8 = vrot.slane %v3452_v48, 7 }
0x1b7a   :  { %v3456_v4 = vsel %vm3437_vm8, %v3455_v8, %v3451_v49 }
0x1b7b   :  { %v3458_v50 = vsel %vm3440_vm9, %v3456_v4, 0.0 }
0x1b7c   :  { %3459 = vadd.xlane.f32.xlu0 %v3458_v50 }
0x1c09   :  { %v3460_v57 = vpop.xlane.xlu0 %3459 }
0x1c0a   :  { %v3461_v58 = vmul.f32 0.03125, %v3460_v57 }
0x1c0c   :  { %v3462_v59 = vadd.f32 1e-05, %v3461_v58 }
0x1c0e   :  { %4387 = vrsqrt.f32 %v3462_v59 }
0x1c18   :  { %v4388_v60 = vpop.eup %4387 }
0x1c19   :  { %v3465_v61 = vrot.slane %v4388_v60, 1  ;;  %v3468_v63 = vmul.f32 %v4388_v60, %v3449_v46 }
0x1c1b   :  { %v3469_v62 = vmul.f32 %v3465_v61, %v3450_v47 }
0x1c1d   :  { %v3483_v1 = vrot.slane %v3469_v62, 7 }
0x1c1f   :  { %v3484_v2 = vsel %vm3437_vm8, %v3483_v1, %v3468_v63 }
0x1c20   :  { %4170 = vmatmul.mubr.msk.f32.vlgmr.msra.gmra.mrb[38].mxu0 %vm295_vm2, %v3484_v2 }
0x1cf3   :  { %v3553_v6 = vpop.f32.mrb[38].mxu0 }
0x1cf4   :  { %v3554_v10 = vadd.f32 %v3784_v3, %v3553_v6  ;;  %v4171_v11 = vpop.f32.mrb[39].mxu0 }
0x1cf6   :  { %v3786_v12 = vmul.f32 -1.442695, %v3554_v10 }
0x1cf8   :  { %4389 = vpow2.f32 %v3786_v12 }
0x1d02   :  { %v4390_v14 = vpop.eup %4389 }
0x1d03   :  { %v3560_v7 = vadd.f32 1.0, %v4390_v14 }
0x1d05   :  { %4391 = vrcp.f32 %v3560_v7 }
0x1d0f   :  { %v4392_v13 = vpop.eup %4391 }
0x1d10   :  { %v3564_v15 = vrot.slane %v4392_v13, 1  ;;  %v3567_v16 = vadd.f32 %v4392_v13, %v3468_v63 }
0x1d12   :  { %v3568_v9 = vadd.f32 %v3564_v15, %v3469_v62 }
0x1d14   :  { %v3571_v17 = vrot.slane %v3568_v9, 7 }
0x1d16   :  { %v3572_v18 = vsel %vm3437_vm8, %v3571_v17, %v3567_v16 }
0x1d17   :  { %v3574_v19 = vsel %vm3440_vm9, %v3572_v18, 0.0 }
0x1d18   :  { %3575 = vadd.xlane.f32.xlu0 %v3574_v19 }
0x1da5   :  { %v3576_v20 = vpop.xlane.xlu0 %3575 }
0x1da6   :  { %v3577_v21 = vmul.f32 0.03125, %v3576_v20 }
0x1da8   :  { %v3579_v22 = vrot.slane %v3577_v21, 1  ;;  %v3582_v23 = vsub.f32 %v3567_v16, %v3577_v21 }
0x1daa   :  { %v3583_v24 = vsub.f32 %v3568_v9, %v3579_v22  ;;  %v3584_v26 = vmul.f32 %v3582_v23, %v3582_v23 }
0x1dac   :  { %v3585_v25 = vmul.f32 %v3583_v24, %v3583_v24 }
0x1dae   :  { %v3588_v27 = vrot.slane %v3585_v25, 7 }
0x1db0   :  { %v3589_v0 = vsel %vm3437_vm8, %v3588_v27, %v3584_v26 }
0x1db1   :  { %v3591_v28 = vsel %vm3440_vm9, %v3589_v0, 0.0 }
0x1db2   :  { %3592 = vadd.xlane.f32.xlu1 %v3591_v28 }
0x1e3f   :  { %v3593_v40 = vpop.xlane.xlu1 %3592 }
0x1e40   :  { %v3594_v42 = vmul.f32 0.03125, %v3593_v40 }
0x1e42   :  { %v3595_v36 = vadd.f32 1e-05, %v3594_v42 }
0x1e44   :  { %4393 = vrsqrt.f32 %v3595_v36 }
0x1e4e   :  { %v4394_v37 = vpop.eup %4393 }
0x1e4f   :  { %v3598_v39 = vrot.slane %v4394_v37, 1  ;;  %v3601_v43 = vmul.f32 %v4394_v37, %v3582_v23 }
0x1e51   :  { %v3602_v41 = vmul.f32 %v3598_v39, %v3583_v24 }
0x1e53   :  { %v3616_v38 = vrot.slane %v3602_v41, 7 }
0x1e55   :  { %v3617_v5 = vsel %vm3437_vm8, %v3616_v38, %v3601_v43 }
0x1e56   :  { %4181 = vmatmul.mubr.msk.f32.vlgmr.msra.gmra.mrb[38].mxu1 %vm295_vm2, %v3617_v5 }
0x1f29   :  { %v3686_v45 = vpop.f32.mrb[38].mxu1 }
0x1f2a   :  { %v3687_v35 = vadd.f32 %v3787_v44, %v3686_v45  ;;  %v4182_v46 = vpop.f32.mrb[39].mxu1 }
0x1f2c   :  { %v3789_v47 = vmul.f32 -1.442695, %v3687_v35 }
0x1f2e   :  { %4395 = vpow2.f32 %v3789_v47 }
0x1f38   :  { %v4396_v48 = vpop.eup %4395 }
0x1f39   :  { %v3693_v49 = vadd.f32 1.0, %v4396_v48 }
0x1f3b   :  { %4397 = vrcp.f32 %v3693_v49 }
0x1f45   :  { %v4398_v8 = vpop.eup %4397 }
0x1f46   :  { %3697 = vst.msk [vmem:[#allocation2] sm:$0x3] %vm3696_vm10, %v4398_v8 }
0x1f47   :  { %4410 = shalt.err (!%p4407_p4)
}
0x1f48   :  { %s4411_s5 = scalar_lea.hbm %s5098_s18, 32 }
0x1f49   :  { %p4412_p5 = scmp.ne.s32.totalorder %s5098_s18, %s4411_s5  ;;  %p4415_p6 = scmp.lt.u32.totalorder %s4411_s5, %s5098_s18 }
0x1f4b   :  { %p4417_p7 = pnand %p4415_p6, %p4412_p5 }
0x1f4d   :  { %4420 = shalt.err (!%p4417_p7)
}
0x1f4e   :  { %3707 = dma.vmem_to_hbm [thread:$0]  %s3705_s29, 32, %s5098_s18, [#allocation3]  }
0x1f4f   :  { %4421 = dma.done.wait [#allocation3], 32  }
0x1f50   :  { %4422 = vsyncadd [#allocation3], 4294967264 }
0x1f51   :  { %3711 = vsyncpa [#allocation3], 1 }

</bundles_post_ra>
